<compile_context>
chip_gen: v7x
topology: tpu7x:2x2x1
jax: 0.10.0
libtpu: 0.0.40
codegen_flags: <defaults>
</compile_context>

<pallas_src>
import math

import jax
import jax.numpy as jnp
from jax import lax
from jax.experimental import pallas as pl
from jax.experimental.pallas import tpu as pltpu

# ----------------------------- model dims -----------------------------------
B = 2            # batch
S = 8            # sequence length
D = 32           # d_model
H = 4            # n_heads
DH = D // H      # per-head dim
F = 64           # dim_feedforward
L = 2            # num_decoder_layers
V = 128          # vocab_size (lane-dense logits)
MAX_LEN = 16     # positional-encoding table length
BS = B * S       # flattened token count
HB = H * BS      # head-major flattened rows (block-diagonal attention)
LN_EPS = 1e-5
NEG_INF = -1e30
LANES = 128

# ----------------------------- slab layouts ----------------------------------
# per-layer weight slab (LAYER_ROWS, 128); all row offsets multiples of 8
R_WQKV = 0                 # (D, 3D)   rows [0, 32)    cols [0, 96)
R_WO   = 32                # (D, D)    rows [32, 64)   cols [0, 32)
R_W1   = 64                # (D, F)    rows [64, 96)   cols [0, 64)
R_W2   = 96                # (F, D)    rows [96, 160)  cols [0, 32)
R_VEC  = 160               # 8 vector rows: bqkv, bo, g1, be1, b1, b2, g2, be2
LAYER_ROWS = 168

# globals slab (G_ROWS, 128)
G_EMB  = 0                 # (V, D)    rows [0, 128)   cols [0, 32)
G_WOUT = 128               # (D, V)    rows [128, 160) cols [0, 128)
G_PE   = 160               # (BS, D)   rows [160, 176) cols [0, 32)
G_BIAS = 176               # (HB, HB)  rows [176, 240) cols [0, 64)
G_BOUT = 240               # (1, V)    row 240         cols [0, 128)
G_ROWS = 248


# ----------------------------- Pallas kernel --------------------------------
def decoder_kernel(tok_ref, glob_ref, layers_ref, out_ref):
    f32 = jnp.float32
    scale = 1.0 / math.sqrt(DH)

    # ---- embedding lookup (gather-free: one-hot @ table) + positional enc ---
    tok = tok_ref[...]                                        # (BS, 1) int32
    vocab_ids = lax.broadcasted_iota(jnp.int32, (BS, V), 1)   # (BS, V)
    onehot = (vocab_ids == tok).astype(f32)                   # (BS, V)
    x = jnp.dot(onehot, glob_ref[G_EMB:G_EMB + V, 0:D],
                preferred_element_type=f32)                   # (BS, D)
    x = x + glob_ref[G_PE:G_PE + BS, 0:D]                     # + PE (dropout=id)

    # head-major block-diag causal bias (also masks cross-head / cross-batch)
    attn_bias = glob_ref[G_BIAS:G_BIAS + HB, 0:HB]            # (HB, HB)

    def layer_norm(h, g, b):
        # one-pass: mean and mean-of-squares reduce independently
        mu = jnp.mean(h, axis=-1, keepdims=True)
        ms = jnp.mean(h * h, axis=-1, keepdims=True)
        var = ms - mu * mu
        return (h - mu) * lax.rsqrt(var + LN_EPS) * g + b

    def head_major(m):        # (BS, D) lanes [h0|h1|h2|h3] -> (H*BS, DH)
        return jnp.concatenate(
            [m[:, h * DH:(h + 1) * DH] for h in range(H)], axis=0)

    for l in range(L):                       # static unroll over decoder layers
        # ---- static-offset slices out of the per-layer weight slab ----------
        wqkv = layers_ref[l, R_WQKV:R_WQKV + D, 0:3 * D]      # (D, 3D)
        wo   = layers_ref[l, R_WO:R_WO + D, 0:D]              # (D, D)
        w1   = layers_ref[l, R_W1:R_W1 + D, 0:F]              # (D, F)
        w2   = layers_ref[l, R_W2:R_W2 + F, 0:D]              # (F, D)
        vecs = layers_ref[l, R_VEC:R_VEC + 8, :]              # (8, 128)
        bqkv = vecs[0:1, 0:3 * D]
        bo   = vecs[1:2, 0:D]
        g1   = vecs[2:3, 0:D]
        be1  = vecs[3:4, 0:D]
        b1   = vecs[4:5, 0:F]
        b2   = vecs[5:6, 0:D]
        g2   = vecs[6:7, 0:D]
        be2  = vecs[7:8, 0:D]

        # ---- fused QKV projection: ONE (BS,D)@(D,3D) matmul ------------------
        qkv = jnp.dot(x, wqkv, preferred_element_type=f32) + bqkv   # (BS, 3D)
        q = qkv[:, 0:D]               # 32-lane aligned [Q_allheads]
        k = qkv[:, D:2 * D]           # [K_allheads]
        v = qkv[:, 2 * D:3 * D]       # [V_allheads]

        # ---- masked self-attention as 2 block-diagonal matmuls ---------------
        q_all = head_major(q)         # (HB, DH)
        k_all = head_major(k)
        v_all = head_major(v)
        sc = lax.dot_general(q_all, k_all, (((1,), (1,)), ((), ())),
                             preferred_element_type=f32) * scale + attn_bias
        sc = sc - jnp.max(sc, axis=-1, keepdims=True)
        p = jnp.exp(sc)
        p = p * pl.reciprocal(jnp.sum(p, axis=-1, keepdims=True), approx=False)
        ctx_all = jnp.dot(p, v_all, preferred_element_type=f32)     # (HB, DH)

        # relayout back to (BS, H*DH) and single output projection
        ctx = jnp.concatenate(
            [ctx_all[h * BS:(h + 1) * BS, :] for h in range(H)], axis=1)  # (BS, D)
        attn = jnp.dot(ctx, wo, preferred_element_type=f32) + bo

        # ---- residual + LN1, FFN, residual + LN2 (dropout = identity) --------
        h1 = layer_norm(x + attn, g1, be1)
        ff = jnp.dot(h1, w1, preferred_element_type=f32) + b1
        ff = jnp.maximum(ff, 0.0)
        ff = jnp.dot(ff, w2, preferred_element_type=f32) + b2
        x = layer_norm(h1 + ff, g2, be2)

    # ---- final vocab projection: lane-dense (BS, 128) store ------------------
    logits = jnp.dot(x, glob_ref[G_WOUT:G_WOUT + D, 0:V],
                     preferred_element_type=f32) + glob_ref[G_BOUT:G_BOUT + 1, 0:V]
    out_ref[...] = logits.astype(out_ref.dtype)


# ----------------------------- host-side packing (done once) -----------------
def pack_globals(emb, pe, w_out, b_out):
    g = jnp.zeros((G_ROWS, LANES), jnp.float32)
    g = g.at[G_EMB:G_EMB + V, 0:D].set(emb)
    g = g.at[G_WOUT:G_WOUT + D, 0:V].set(w_out)
    g = g.at[G_PE:G_PE + BS, 0:D].set(jnp.tile(pe[:S], (B, 1)))
    # head-major block-diagonal causal additive bias over (H*BS) rows/cols
    r = jnp.arange(HB)
    head = r // BS
    tokflat = r % BS
    batch = tokflat // S
    pos = tokflat % S
    allowed = (head[:, None] == head[None, :]) & \
              (batch[:, None] == batch[None, :]) & \
              (pos[:, None] >= pos[None, :])
    bias = jnp.where(allowed, 0.0, NEG_INF).astype(jnp.float32)
    g = g.at[G_BIAS:G_BIAS + HB, 0:HB].set(bias)
    g = g.at[G_BOUT, 0:V].set(b_out)
    return g


def pack_layers(layer_params):
    blocks = []
    for p in layer_params:
        (wq, bq, wk, bk, wv, bv, wo, bo,
         g1, be1, w1, b1, w2, b2, g2, be2) = p
        blk = jnp.zeros((LAYER_ROWS, LANES), jnp.float32)
        wqkv = jnp.concatenate([wq, wk, wv], axis=1)          # (D, 3D)
        bqkv = jnp.concatenate([bq, bk, bv], axis=0)          # (3D,)
        blk = blk.at[R_WQKV:R_WQKV + D, 0:3 * D].set(wqkv)
        blk = blk.at[R_WO:R_WO + D, 0:D].set(wo)
        blk = blk.at[R_W1:R_W1 + D, 0:F].set(w1)
        blk = blk.at[R_W2:R_W2 + F, 0:D].set(w2)
        blk = blk.at[R_VEC + 0, 0:3 * D].set(bqkv)
        blk = blk.at[R_VEC + 1, 0:D].set(bo)
        blk = blk.at[R_VEC + 2, 0:D].set(g1)
        blk = blk.at[R_VEC + 3, 0:D].set(be1)
        blk = blk.at[R_VEC + 4, 0:F].set(b1)
        blk = blk.at[R_VEC + 5, 0:D].set(b2)
        blk = blk.at[R_VEC + 6, 0:D].set(g2)
        blk = blk.at[R_VEC + 7, 0:D].set(be2)
        blocks.append(blk)
    return jnp.stack(blocks)                                  # (L, LAYER_ROWS, 128)


# ----------------------------- wrapper ---------------------------------------
@jax.jit
def decoder_forward(tok, glob_slab, layers_slab):
    """Full Decoder forward as a single grid-less pallas_call."""
    tok_flat = tok.reshape(BS, 1).astype(jnp.int32)
    vmem = pl.BlockSpec(memory_space=pltpu.MemorySpace.VMEM)
    logits = pl.pallas_call(
        decoder_kernel,
        out_shape=jax.ShapeDtypeStruct((BS, V), jnp.float32),
        in_specs=[vmem, vmem, vmem],
        out_specs=vmem,
        # no grid: single invocation, everything VMEM-resident
    )(tok_flat, glob_slab, layers_slab)
    return logits.reshape(B, S, V)


# ----------------------------- pure-JAX reference ----------------------------
def decoder_ref(tok, emb, pe, layer_params, w_out, b_out):
    def layer_norm(h, g, b):
        mu = jnp.mean(h, axis=-1, keepdims=True)
        var = jnp.mean((h - mu) ** 2, axis=-1, keepdims=True)
        return (h - mu) * lax.rsqrt(var + LN_EPS) * g + b

    x = emb[tok] + pe[None, :S, :]                                    # (B, S, D)
    causal = jnp.tril(jnp.ones((S, S), dtype=bool))
    for (wq, bq, wk, bk, wv, bv, wo, bo,
         g1, be1, w1, b1, w2, b2, g2, be2) in layer_params:
        q = (x @ wq + bq).reshape(B, S, H, DH).transpose(0, 2, 1, 3)
        k = (x @ wk + bk).reshape(B, S, H, DH).transpose(0, 2, 1, 3)
        v = (x @ wv + bv).reshape(B, S, H, DH).transpose(0, 2, 1, 3)
        sc = jnp.einsum("bhqd,bhkd->bhqk", q, k) / math.sqrt(DH)
        sc = jnp.where(causal, sc, NEG_INF)
        p = jax.nn.softmax(sc, axis=-1)
        attn = jnp.einsum("bhqk,bhkd->bhqd", p, v).transpose(0, 2, 1, 3)
        attn = attn.reshape(B, S, D) @ wo + bo
        h1 = layer_norm(x + attn, g1, be1)
        ff = jnp.maximum(h1 @ w1 + b1, 0.0) @ w2 + b2
        x = layer_norm(h1 + ff, g2, be2)
    return x @ w_out + b_out


def sinusoidal_pe(max_len, d_model):
    pos = jnp.arange(max_len, dtype=jnp.float32)[:, None]
    idx = jnp.arange(0, d_model, 2, dtype=jnp.float32)
    div = jnp.exp(-idx * (math.log(10000.0) / d_model))
    pe = jnp.zeros((max_len, d_model), jnp.float32)
    pe = pe.at[:, 0::2].set(jnp.sin(pos * div))
    pe = pe.at[:, 1::2].set(jnp.cos(pos * div))
    return pe


# ----------------------------- main ------------------------------------------
if __name__ == "__main__":
    key = jax.random.PRNGKey(0)
    k_tok, k_emb, k_out, *k_layers = jax.random.split(key, 3 + L)

    def init(k, shape, fan_in):
        return jax.random.normal(k, shape, jnp.float32) / math.sqrt(fan_in)

    def make_layer(k):
        ks = jax.random.split(k, 6)
        wq = init(ks[0], (D, D), D); bq = jnp.zeros((D,), jnp.float32)
        wk = init(ks[1], (D, D), D); bk = jnp.zeros((D,), jnp.float32)
        wv = init(ks[2], (D, D), D); bv = jnp.zeros((D,), jnp.float32)
        wo = init(ks[3], (D, D), D); bo = 0.01 * jnp.ones((D,), jnp.float32)
        g1 = jnp.ones((D,), jnp.float32); be1 = jnp.zeros((D,), jnp.float32)
        w1 = init(ks[4], (D, F), D); b1 = 0.01 * jnp.ones((F,), jnp.float32)
        w2 = init(ks[5], (F, D), F); b2 = 0.01 * jnp.ones((D,), jnp.float32)
        g2 = jnp.ones((D,), jnp.float32); be2 = jnp.zeros((D,), jnp.float32)
        return (wq, bq, wk, bk, wv, bv, wo, bo,
                g1, be1, w1, b1, w2, b2, g2, be2)

    layer_params = [make_layer(k) for k in k_layers]
    emb = jax.random.normal(k_emb, (V, D), jnp.float32)
    pe = sinusoidal_pe(MAX_LEN, D)
    w_out = init(k_out, (D, V), D)
    b_out = jnp.zeros((V,), jnp.float32)
    tok = jax.random.randint(k_tok, (B, S), 0, V, dtype=jnp.int32)

    # host-side packing done ONCE (hoisted out of the per-call path)
    glob_slab = jax.block_until_ready(pack_globals(emb, pe, w_out, b_out))
    layers_slab = jax.block_until_ready(pack_layers(layer_params))

    out = decoder_forward(tok, glob_slab, layers_slab)
    out = jax.block_until_ready(out)

    ref = decoder_ref(tok, emb, pe, layer_params, w_out, b_out)
    assert out.shape == (B, S, V)
    err = float(jnp.max(jnp.abs(out - ref)))
    assert jnp.allclose(out, ref, atol=2e-4, rtol=2e-4), err

    print("KERNEL_OK")
</pallas_src>

<mosaic_0001>
module attributes {stable_mosaic.version = 11 : i64} {
  func.func @decoder_kernel(%arg0: memref<16x1xi32, #tpu.memory_space<vmem>>, %arg1: memref<248x128xf32, #tpu.memory_space<vmem>>, %arg2: memref<2x168x128xf32, #tpu.memory_space<vmem>>, %arg3: memref<16x128xf32, #tpu.memory_space<vmem>>) attributes {dimension_semantics = [], scalar_prefetch = 0 : i64, scratch_operands = 0 : i64, tpu.core_type = #tpu.core_type<tc>} {
    %c0 = arith.constant 0 : index
    %c0_0 = arith.constant 0 : index
    %0 = vector.load %arg0[%c0, %c0_0] : memref<16x1xi32, #tpu.memory_space<vmem>>, vector<16x1xi32>
    %1 = tpu.iota {dimensions = array<i32: 1>} : vector<16x128xi32>
    %2 = vector.broadcast %0 : vector<16x1xi32> to vector<16x128xi32>
    %3 = arith.cmpi eq, %1, %2 : vector<16x128xi32>
    %4 = arith.extui %3 : vector<16x128xi1> to vector<16x128xi32>
    %5 = arith.sitofp %4 : vector<16x128xi32> to vector<16x128xf32>
    %c0_1 = arith.constant 0 : index
    %c0_2 = arith.constant 0 : index
    %6 = vector.load %arg1[%c0_1, %c0_2] : memref<248x128xf32, #tpu.memory_space<vmem>>, vector<128x32xf32>
    %cst = arith.constant dense<0.000000e+00> : vector<16x32xf32>
    %7 = tpu.matmul %5, %6, %cst {dimension_numbers = #tpu.dot_dimension_numbers<[1], [0], [0], [1], [0, 0, 1, 1], [], []>} : vector<16x128xf32>, vector<128x32xf32>, vector<16x32xf32> -> vector<16x32xf32>
    %c160 = arith.constant 160 : index
    %c0_3 = arith.constant 0 : index
    %8 = vector.load %arg1[%c160, %c0_3] : memref<248x128xf32, #tpu.memory_space<vmem>>, vector<16x32xf32>
    %9 = arith.addf %7, %8 : vector<16x32xf32>
    %c176 = arith.constant 176 : index
    %c0_4 = arith.constant 0 : index
    %10 = vector.load %arg1[%c176, %c0_4] : memref<248x128xf32, #tpu.memory_space<vmem>>, vector<64x64xf32>
    %c0_5 = arith.constant 0 : index
    %c0_6 = arith.constant 0 : index
    %c0_7 = arith.constant 0 : index
    %11 = vector.load %arg2[%c0_5, %c0_6, %c0_7] : memref<2x168x128xf32, #tpu.memory_space<vmem>>, vector<1x32x96xf32>
    %12 = vector.shape_cast %11 : vector<1x32x96xf32> to vector<32x96xf32>
    %c0_8 = arith.constant 0 : index
    %c32 = arith.constant 32 : index
    %c0_9 = arith.constant 0 : index
    %13 = vector.load %arg2[%c0_8, %c32, %c0_9] : memref<2x168x128xf32, #tpu.memory_space<vmem>>, vector<1x32x32xf32>
    %14 = vector.shape_cast %13 : vector<1x32x32xf32> to vector<32x32xf32>
    %c0_10 = arith.constant 0 : index
    %c64 = arith.constant 64 : index
    %c0_11 = arith.constant 0 : index
    %15 = vector.load %arg2[%c0_10, %c64, %c0_11] : memref<2x168x128xf32, #tpu.memory_space<vmem>>, vector<1x32x64xf32>
    %16 = vector.shape_cast %15 : vector<1x32x64xf32> to vector<32x64xf32>
    %c0_12 = arith.constant 0 : index
    %c96 = arith.constant 96 : index
    %c0_13 = arith.constant 0 : index
    %17 = vector.load %arg2[%c0_12, %c96, %c0_13] : memref<2x168x128xf32, #tpu.memory_space<vmem>>, vector<1x64x32xf32>
    %18 = vector.shape_cast %17 : vector<1x64x32xf32> to vector<64x32xf32>
    %c0_14 = arith.constant 0 : index
    %c160_15 = arith.constant 160 : index
    %c0_16 = arith.constant 0 : index
    %19 = vector.load %arg2[%c0_14, %c160_15, %c0_16] : memref<2x168x128xf32, #tpu.memory_space<vmem>>, vector<1x8x128xf32>
    %20 = vector.shape_cast %19 : vector<1x8x128xf32> to vector<8x128xf32>
    %21 = vector.extract_strided_slice %20 {offsets = [0, 0], sizes = [1, 96], strides = [1, 1]} : vector<8x128xf32> to vector<1x96xf32>
    %22 = vector.extract_strided_slice %20 {offsets = [1, 0], sizes = [1, 32], strides = [1, 1]} : vector<8x128xf32> to vector<1x32xf32>
    %23 = vector.extract_strided_slice %20 {offsets = [2, 0], sizes = [1, 32], strides = [1, 1]} : vector<8x128xf32> to vector<1x32xf32>
    %24 = vector.extract_strided_slice %20 {offsets = [3, 0], sizes = [1, 32], strides = [1, 1]} : vector<8x128xf32> to vector<1x32xf32>
    %25 = vector.extract_strided_slice %20 {offsets = [4, 0], sizes = [1, 64], strides = [1, 1]} : vector<8x128xf32> to vector<1x64xf32>
    %26 = vector.extract_strided_slice %20 {offsets = [5, 0], sizes = [1, 32], strides = [1, 1]} : vector<8x128xf32> to vector<1x32xf32>
    %27 = vector.extract_strided_slice %20 {offsets = [6, 0], sizes = [1, 32], strides = [1, 1]} : vector<8x128xf32> to vector<1x32xf32>
    %28 = vector.extract_strided_slice %20 {offsets = [7, 0], sizes = [1, 32], strides = [1, 1]} : vector<8x128xf32> to vector<1x32xf32>
    %cst_17 = arith.constant dense<0.000000e+00> : vector<16x96xf32>
    %29 = tpu.matmul %9, %12, %cst_17 {dimension_numbers = #tpu.dot_dimension_numbers<[1], [0], [0], [1], [0, 0, 1, 1], [], []>} : vector<16x32xf32>, vector<32x96xf32>, vector<16x96xf32> -> vector<16x96xf32>
    %30 = vector.broadcast %21 : vector<1x96xf32> to vector<16x96xf32>
    %31 = arith.addf %29, %30 : vector<16x96xf32>
    %32 = vector.extract_strided_slice %31 {offsets = [0, 0], sizes = [16, 32], strides = [1, 1]} : vector<16x96xf32> to vector<16x32xf32>
    %33 = vector.extract_strided_slice %31 {offsets = [0, 32], sizes = [16, 32], strides = [1, 1]} : vector<16x96xf32> to vector<16x32xf32>
    %34 = vector.extract_strided_slice %31 {offsets = [0, 64], sizes = [16, 32], strides = [1, 1]} : vector<16x96xf32> to vector<16x32xf32>
    %35 = vector.extract_strided_slice %32 {offsets = [0, 0], sizes = [16, 8], strides = [1, 1]} : vector<16x32xf32> to vector<16x8xf32>
    %36 = vector.extract_strided_slice %32 {offsets = [0, 8], sizes = [16, 8], strides = [1, 1]} : vector<16x32xf32> to vector<16x8xf32>
    %37 = vector.extract_strided_slice %32 {offsets = [0, 16], sizes = [16, 8], strides = [1, 1]} : vector<16x32xf32> to vector<16x8xf32>
    %38 = vector.extract_strided_slice %32 {offsets = [0, 24], sizes = [16, 8], strides = [1, 1]} : vector<16x32xf32> to vector<16x8xf32>
    %39 = tpu.concatenate %35, %36, %37, %38 in 0 : vector<16x8xf32>, vector<16x8xf32>, vector<16x8xf32>, vector<16x8xf32> -> vector<64x8xf32>
    %40 = vector.extract_strided_slice %33 {offsets = [0, 0], sizes = [16, 8], strides = [1, 1]} : vector<16x32xf32> to vector<16x8xf32>
    %41 = vector.extract_strided_slice %33 {offsets = [0, 8], sizes = [16, 8], strides = [1, 1]} : vector<16x32xf32> to vector<16x8xf32>
    %42 = vector.extract_strided_slice %33 {offsets = [0, 16], sizes = [16, 8], strides = [1, 1]} : vector<16x32xf32> to vector<16x8xf32>
    %43 = vector.extract_strided_slice %33 {offsets = [0, 24], sizes = [16, 8], strides = [1, 1]} : vector<16x32xf32> to vector<16x8xf32>
    %44 = tpu.concatenate %40, %41, %42, %43 in 0 : vector<16x8xf32>, vector<16x8xf32>, vector<16x8xf32>, vector<16x8xf32> -> vector<64x8xf32>
    %45 = vector.extract_strided_slice %34 {offsets = [0, 0], sizes = [16, 8], strides = [1, 1]} : vector<16x32xf32> to vector<16x8xf32>
    %46 = vector.extract_strided_slice %34 {offsets = [0, 8], sizes = [16, 8], strides = [1, 1]} : vector<16x32xf32> to vector<16x8xf32>
    %47 = vector.extract_strided_slice %34 {offsets = [0, 16], sizes = [16, 8], strides = [1, 1]} : vector<16x32xf32> to vector<16x8xf32>
    %48 = vector.extract_strided_slice %34 {offsets = [0, 24], sizes = [16, 8], strides = [1, 1]} : vector<16x32xf32> to vector<16x8xf32>
    %49 = tpu.concatenate %45, %46, %47, %48 in 0 : vector<16x8xf32>, vector<16x8xf32>, vector<16x8xf32>, vector<16x8xf32> -> vector<64x8xf32>
    %cst_18 = arith.constant dense<0.000000e+00> : vector<64x64xf32>
    %50 = tpu.matmul %39, %44, %cst_18 {dimension_numbers = #tpu.dot_dimension_numbers<[1], [1], [0], [0], [0, 0, 1, 0], [], []>} : vector<64x8xf32>, vector<64x8xf32>, vector<64x64xf32> -> vector<64x64xf32>
    %cst_19 = arith.constant 0.353553385 : f32
    %51 = vector.broadcast %cst_19 : f32 to vector<64x64xf32>
    %52 = arith.mulf %50, %51 : vector<64x64xf32>
    %53 = arith.addf %52, %10 : vector<64x64xf32>
    %cst_20 = arith.constant dense<0xFF800000> : vector<64xf32>
    %54 = vector.multi_reduction <maximumf>, %53, %cst_20 [1] : vector<64x64xf32> to vector<64xf32>
    %55 = vector.shape_cast %54 : vector<64xf32> to vector<64x1xf32>
    %56 = vector.broadcast %55 : vector<64x1xf32> to vector<64x64xf32>
    %57 = arith.subf %53, %56 : vector<64x64xf32>
    %58 = math.exp %57 : vector<64x64xf32>
    %cst_21 = arith.constant dense<0.000000e+00> : vector<64xf32>
    %59 = vector.multi_reduction <add>, %58, %cst_21 [1] : vector<64x64xf32> to vector<64xf32>
    %60 = vector.shape_cast %59 : vector<64xf32> to vector<64x1xf32>
    %61 = tpu.reciprocal %60 : vector<64x1xf32> -> vector<64x1xf32>
    %62 = vector.broadcast %61 : vector<64x1xf32> to vector<64x64xf32>
    %63 = arith.mulf %58, %62 : vector<64x64xf32>
    %cst_22 = arith.constant dense<0.000000e+00> : vector<64x8xf32>
    %64 = tpu.matmul %63, %49, %cst_22 {dimension_numbers = #tpu.dot_dimension_numbers<[1], [0], [0], [1], [0, 0, 1, 1], [], []>} : vector<64x64xf32>, vector<64x8xf32>, vector<64x8xf32> -> vector<64x8xf32>
    %65 = vector.extract_strided_slice %64 {offsets = [0, 0], sizes = [16, 8], strides = [1, 1]} : vector<64x8xf32> to vector<16x8xf32>
    %66 = vector.extract_strided_slice %64 {offsets = [16, 0], sizes = [16, 8], strides = [1, 1]} : vector<64x8xf32> to vector<16x8xf32>
    %67 = vector.extract_strided_slice %64 {offsets = [32, 0], sizes = [16, 8], strides = [1, 1]} : vector<64x8xf32> to vector<16x8xf32>
    %68 = vector.extract_strided_slice %64 {offsets = [48, 0], sizes = [16, 8], strides = [1, 1]} : vector<64x8xf32> to vector<16x8xf32>
    %69 = tpu.concatenate %65, %66, %67, %68 in 1 : vector<16x8xf32>, vector<16x8xf32>, vector<16x8xf32>, vector<16x8xf32> -> vector<16x32xf32>
    %cst_23 = arith.constant dense<0.000000e+00> : vector<16x32xf32>
    %70 = tpu.matmul %69, %14, %cst_23 {dimension_numbers = #tpu.dot_dimension_numbers<[1], [0], [0], [1], [0, 0, 1, 1], [], []>} : vector<16x32xf32>, vector<32x32xf32>, vector<16x32xf32> -> vector<16x32xf32>
    %71 = vector.broadcast %22 : vector<1x32xf32> to vector<16x32xf32>
    %72 = arith.addf %70, %71 : vector<16x32xf32>
    %73 = arith.addf %9, %72 : vector<16x32xf32>
    %cst_24 = arith.constant dense<0.000000e+00> : vector<16xf32>
    %74 = vector.multi_reduction <add>, %73, %cst_24 [1] : vector<16x32xf32> to vector<16xf32>
    %75 = vector.shape_cast %74 : vector<16xf32> to vector<16x1xf32>
    %cst_25 = arith.constant 3.200000e+01 : f32
    %76 = vector.broadcast %cst_25 : f32 to vector<16x1xf32>
    %77 = arith.divf %75, %76 : vector<16x1xf32>
    %78 = arith.mulf %73, %73 : vector<16x32xf32>
    %cst_26 = arith.constant dense<0.000000e+00> : vector<16xf32>
    %79 = vector.multi_reduction <add>, %78, %cst_26 [1] : vector<16x32xf32> to vector<16xf32>
    %80 = vector.shape_cast %79 : vector<16xf32> to vector<16x1xf32>
    %cst_27 = arith.constant 3.200000e+01 : f32
    %81 = vector.broadcast %cst_27 : f32 to vector<16x1xf32>
    %82 = arith.divf %80, %81 : vector<16x1xf32>
    %83 = arith.mulf %77, %77 : vector<16x1xf32>
    %84 = arith.subf %82, %83 : vector<16x1xf32>
    %85 = vector.broadcast %77 : vector<16x1xf32> to vector<16x32xf32>
    %86 = arith.subf %73, %85 : vector<16x32xf32>
    %cst_28 = arith.constant 9.99999974E-6 : f32
    %87 = vector.broadcast %cst_28 : f32 to vector<16x1xf32>
    %88 = arith.addf %84, %87 : vector<16x1xf32>
    %89 = math.rsqrt %88 : vector<16x1xf32>
    %90 = vector.broadcast %89 : vector<16x1xf32> to vector<16x32xf32>
    %91 = arith.mulf %86, %90 : vector<16x32xf32>
    %92 = vector.broadcast %23 : vector<1x32xf32> to vector<16x32xf32>
    %93 = arith.mulf %91, %92 : vector<16x32xf32>
    %94 = vector.broadcast %24 : vector<1x32xf32> to vector<16x32xf32>
    %95 = arith.addf %93, %94 : vector<16x32xf32>
    %cst_29 = arith.constant dense<0.000000e+00> : vector<16x64xf32>
    %96 = tpu.matmul %95, %16, %cst_29 {dimension_numbers = #tpu.dot_dimension_numbers<[1], [0], [0], [1], [0, 0, 1, 1], [], []>} : vector<16x32xf32>, vector<32x64xf32>, vector<16x64xf32> -> vector<16x64xf32>
    %97 = vector.broadcast %25 : vector<1x64xf32> to vector<16x64xf32>
    %98 = arith.addf %96, %97 : vector<16x64xf32>
    %cst_30 = arith.constant 0.000000e+00 : f32
    %99 = vector.broadcast %cst_30 : f32 to vector<16x64xf32>
    %100 = arith.maximumf %98, %99 : vector<16x64xf32>
    %cst_31 = arith.constant dense<0.000000e+00> : vector<16x32xf32>
    %101 = tpu.matmul %100, %18, %cst_31 {dimension_numbers = #tpu.dot_dimension_numbers<[1], [0], [0], [1], [0, 0, 1, 1], [], []>} : vector<16x64xf32>, vector<64x32xf32>, vector<16x32xf32> -> vector<16x32xf32>
    %102 = vector.broadcast %26 : vector<1x32xf32> to vector<16x32xf32>
    %103 = arith.addf %101, %102 : vector<16x32xf32>
    %104 = arith.addf %95, %103 : vector<16x32xf32>
    %cst_32 = arith.constant dense<0.000000e+00> : vector<16xf32>
    %105 = vector.multi_reduction <add>, %104, %cst_32 [1] : vector<16x32xf32> to vector<16xf32>
    %106 = vector.shape_cast %105 : vector<16xf32> to vector<16x1xf32>
    %cst_33 = arith.constant 3.200000e+01 : f32
    %107 = vector.broadcast %cst_33 : f32 to vector<16x1xf32>
    %108 = arith.divf %106, %107 : vector<16x1xf32>
    %109 = arith.mulf %104, %104 : vector<16x32xf32>
    %cst_34 = arith.constant dense<0.000000e+00> : vector<16xf32>
    %110 = vector.multi_reduction <add>, %109, %cst_34 [1] : vector<16x32xf32> to vector<16xf32>
    %111 = vector.shape_cast %110 : vector<16xf32> to vector<16x1xf32>
    %cst_35 = arith.constant 3.200000e+01 : f32
    %112 = vector.broadcast %cst_35 : f32 to vector<16x1xf32>
    %113 = arith.divf %111, %112 : vector<16x1xf32>
    %114 = arith.mulf %108, %108 : vector<16x1xf32>
    %115 = arith.subf %113, %114 : vector<16x1xf32>
    %116 = vector.broadcast %108 : vector<16x1xf32> to vector<16x32xf32>
    %117 = arith.subf %104, %116 : vector<16x32xf32>
    %cst_36 = arith.constant 9.99999974E-6 : f32
    %118 = vector.broadcast %cst_36 : f32 to vector<16x1xf32>
    %119 = arith.addf %115, %118 : vector<16x1xf32>
    %120 = math.rsqrt %119 : vector<16x1xf32>
    %121 = vector.broadcast %120 : vector<16x1xf32> to vector<16x32xf32>
    %122 = arith.mulf %117, %121 : vector<16x32xf32>
    %123 = vector.broadcast %27 : vector<1x32xf32> to vector<16x32xf32>
    %124 = arith.mulf %122, %123 : vector<16x32xf32>
    %125 = vector.broadcast %28 : vector<1x32xf32> to vector<16x32xf32>
    %126 = arith.addf %124, %125 : vector<16x32xf32>
    %c1 = arith.constant 1 : index
    %c0_37 = arith.constant 0 : index
    %c0_38 = arith.constant 0 : index
    %127 = vector.load %arg2[%c1, %c0_37, %c0_38] : memref<2x168x128xf32, #tpu.memory_space<vmem>>, vector<1x32x96xf32>
    %128 = vector.shape_cast %127 : vector<1x32x96xf32> to vector<32x96xf32>
    %c1_39 = arith.constant 1 : index
    %c32_40 = arith.constant 32 : index
    %c0_41 = arith.constant 0 : index
    %129 = vector.load %arg2[%c1_39, %c32_40, %c0_41] : memref<2x168x128xf32, #tpu.memory_space<vmem>>, vector<1x32x32xf32>
    %130 = vector.shape_cast %129 : vector<1x32x32xf32> to vector<32x32xf32>
    %c1_42 = arith.constant 1 : index
    %c64_43 = arith.constant 64 : index
    %c0_44 = arith.constant 0 : index
    %131 = vector.load %arg2[%c1_42, %c64_43, %c0_44] : memref<2x168x128xf32, #tpu.memory_space<vmem>>, vector<1x32x64xf32>
    %132 = vector.shape_cast %131 : vector<1x32x64xf32> to vector<32x64xf32>
    %c1_45 = arith.constant 1 : index
    %c96_46 = arith.constant 96 : index
    %c0_47 = arith.constant 0 : index
    %133 = vector.load %arg2[%c1_45, %c96_46, %c0_47] : memref<2x168x128xf32, #tpu.memory_space<vmem>>, vector<1x64x32xf32>
    %134 = vector.shape_cast %133 : vector<1x64x32xf32> to vector<64x32xf32>
    %c1_48 = arith.constant 1 : index
    %c160_49 = arith.constant 160 : index
    %c0_50 = arith.constant 0 : index
    %135 = vector.load %arg2[%c1_48, %c160_49, %c0_50] : memref<2x168x128xf32, #tpu.memory_space<vmem>>, vector<1x8x128xf32>
    %136 = vector.shape_cast %135 : vector<1x8x128xf32> to vector<8x128xf32>
    %137 = vector.extract_strided_slice %136 {offsets = [0, 0], sizes = [1, 96], strides = [1, 1]} : vector<8x128xf32> to vector<1x96xf32>
    %138 = vector.extract_strided_slice %136 {offsets = [1, 0], sizes = [1, 32], strides = [1, 1]} : vector<8x128xf32> to vector<1x32xf32>
    %139 = vector.extract_strided_slice %136 {offsets = [2, 0], sizes = [1, 32], strides = [1, 1]} : vector<8x128xf32> to vector<1x32xf32>
    %140 = vector.extract_strided_slice %136 {offsets = [3, 0], sizes = [1, 32], strides = [1, 1]} : vector<8x128xf32> to vector<1x32xf32>
    %141 = vector.extract_strided_slice %136 {offsets = [4, 0], sizes = [1, 64], strides = [1, 1]} : vector<8x128xf32> to vector<1x64xf32>
    %142 = vector.extract_strided_slice %136 {offsets = [5, 0], sizes = [1, 32], strides = [1, 1]} : vector<8x128xf32> to vector<1x32xf32>
    %143 = vector.extract_strided_slice %136 {offsets = [6, 0], sizes = [1, 32], strides = [1, 1]} : vector<8x128xf32> to vector<1x32xf32>
    %144 = vector.extract_strided_slice %136 {offsets = [7, 0], sizes = [1, 32], strides = [1, 1]} : vector<8x128xf32> to vector<1x32xf32>
    %cst_51 = arith.constant dense<0.000000e+00> : vector<16x96xf32>
    %145 = tpu.matmul %126, %128, %cst_51 {dimension_numbers = #tpu.dot_dimension_numbers<[1], [0], [0], [1], [0, 0, 1, 1], [], []>} : vector<16x32xf32>, vector<32x96xf32>, vector<16x96xf32> -> vector<16x96xf32>
    %146 = vector.broadcast %137 : vector<1x96xf32> to vector<16x96xf32>
    %147 = arith.addf %145, %146 : vector<16x96xf32>
    %148 = vector.extract_strided_slice %147 {offsets = [0, 0], sizes = [16, 32], strides = [1, 1]} : vector<16x96xf32> to vector<16x32xf32>
    %149 = vector.extract_strided_slice %147 {offsets = [0, 32], sizes = [16, 32], strides = [1, 1]} : vector<16x96xf32> to vector<16x32xf32>
    %150 = vector.extract_strided_slice %147 {offsets = [0, 64], sizes = [16, 32], strides = [1, 1]} : vector<16x96xf32> to vector<16x32xf32>
    %151 = vector.extract_strided_slice %148 {offsets = [0, 0], sizes = [16, 8], strides = [1, 1]} : vector<16x32xf32> to vector<16x8xf32>
    %152 = vector.extract_strided_slice %148 {offsets = [0, 8], sizes = [16, 8], strides = [1, 1]} : vector<16x32xf32> to vector<16x8xf32>
    %153 = vector.extract_strided_slice %148 {offsets = [0, 16], sizes = [16, 8], strides = [1, 1]} : vector<16x32xf32> to vector<16x8xf32>
    %154 = vector.extract_strided_slice %148 {offsets = [0, 24], sizes = [16, 8], strides = [1, 1]} : vector<16x32xf32> to vector<16x8xf32>
    %155 = tpu.concatenate %151, %152, %153, %154 in 0 : vector<16x8xf32>, vector<16x8xf32>, vector<16x8xf32>, vector<16x8xf32> -> vector<64x8xf32>
    %156 = vector.extract_strided_slice %149 {offsets = [0, 0], sizes = [16, 8], strides = [1, 1]} : vector<16x32xf32> to vector<16x8xf32>
    %157 = vector.extract_strided_slice %149 {offsets = [0, 8], sizes = [16, 8], strides = [1, 1]} : vector<16x32xf32> to vector<16x8xf32>
    %158 = vector.extract_strided_slice %149 {offsets = [0, 16], sizes = [16, 8], strides = [1, 1]} : vector<16x32xf32> to vector<16x8xf32>
    %159 = vector.extract_strided_slice %149 {offsets = [0, 24], sizes = [16, 8], strides = [1, 1]} : vector<16x32xf32> to vector<16x8xf32>
    %160 = tpu.concatenate %156, %157, %158, %159 in 0 : vector<16x8xf32>, vector<16x8xf32>, vector<16x8xf32>, vector<16x8xf32> -> vector<64x8xf32>
    %161 = vector.extract_strided_slice %150 {offsets = [0, 0], sizes = [16, 8], strides = [1, 1]} : vector<16x32xf32> to vector<16x8xf32>
    %162 = vector.extract_strided_slice %150 {offsets = [0, 8], sizes = [16, 8], strides = [1, 1]} : vector<16x32xf32> to vector<16x8xf32>
    %163 = vector.extract_strided_slice %150 {offsets = [0, 16], sizes = [16, 8], strides = [1, 1]} : vector<16x32xf32> to vector<16x8xf32>
    %164 = vector.extract_strided_slice %150 {offsets = [0, 24], sizes = [16, 8], strides = [1, 1]} : vector<16x32xf32> to vector<16x8xf32>
    %165 = tpu.concatenate %161, %162, %163, %164 in 0 : vector<16x8xf32>, vector<16x8xf32>, vector<16x8xf32>, vector<16x8xf32> -> vector<64x8xf32>
    %cst_52 = arith.constant dense<0.000000e+00> : vector<64x64xf32>
    %166 = tpu.matmul %155, %160, %cst_52 {dimension_numbers = #tpu.dot_dimension_numbers<[1], [1], [0], [0], [0, 0, 1, 0], [], []>} : vector<64x8xf32>, vector<64x8xf32>, vector<64x64xf32> -> vector<64x64xf32>
    %cst_53 = arith.constant 0.353553385 : f32
    %167 = vector.broadcast %cst_53 : f32 to vector<64x64xf32>
    %168 = arith.mulf %166, %167 : vector<64x64xf32>
    %169 = arith.addf %168, %10 : vector<64x64xf32>
    %cst_54 = arith.constant dense<0xFF800000> : vector<64xf32>
    %170 = vector.multi_reduction <maximumf>, %169, %cst_54 [1] : vector<64x64xf32> to vector<64xf32>
    %171 = vector.shape_cast %170 : vector<64xf32> to vector<64x1xf32>
    %172 = vector.broadcast %171 : vector<64x1xf32> to vector<64x64xf32>
    %173 = arith.subf %169, %172 : vector<64x64xf32>
    %174 = math.exp %173 : vector<64x64xf32>
    %cst_55 = arith.constant dense<0.000000e+00> : vector<64xf32>
    %175 = vector.multi_reduction <add>, %174, %cst_55 [1] : vector<64x64xf32> to vector<64xf32>
    %176 = vector.shape_cast %175 : vector<64xf32> to vector<64x1xf32>
    %177 = tpu.reciprocal %176 : vector<64x1xf32> -> vector<64x1xf32>
    %178 = vector.broadcast %177 : vector<64x1xf32> to vector<64x64xf32>
    %179 = arith.mulf %174, %178 : vector<64x64xf32>
    %cst_56 = arith.constant dense<0.000000e+00> : vector<64x8xf32>
    %180 = tpu.matmul %179, %165, %cst_56 {dimension_numbers = #tpu.dot_dimension_numbers<[1], [0], [0], [1], [0, 0, 1, 1], [], []>} : vector<64x64xf32>, vector<64x8xf32>, vector<64x8xf32> -> vector<64x8xf32>
    %181 = vector.extract_strided_slice %180 {offsets = [0, 0], sizes = [16, 8], strides = [1, 1]} : vector<64x8xf32> to vector<16x8xf32>
    %182 = vector.extract_strided_slice %180 {offsets = [16, 0], sizes = [16, 8], strides = [1, 1]} : vector<64x8xf32> to vector<16x8xf32>
    %183 = vector.extract_strided_slice %180 {offsets = [32, 0], sizes = [16, 8], strides = [1, 1]} : vector<64x8xf32> to vector<16x8xf32>
    %184 = vector.extract_strided_slice %180 {offsets = [48, 0], sizes = [16, 8], strides = [1, 1]} : vector<64x8xf32> to vector<16x8xf32>
    %185 = tpu.concatenate %181, %182, %183, %184 in 1 : vector<16x8xf32>, vector<16x8xf32>, vector<16x8xf32>, vector<16x8xf32> -> vector<16x32xf32>
    %cst_57 = arith.constant dense<0.000000e+00> : vector<16x32xf32>
    %186 = tpu.matmul %185, %130, %cst_57 {dimension_numbers = #tpu.dot_dimension_numbers<[1], [0], [0], [1], [0, 0, 1, 1], [], []>} : vector<16x32xf32>, vector<32x32xf32>, vector<16x32xf32> -> vector<16x32xf32>
    %187 = vector.broadcast %138 : vector<1x32xf32> to vector<16x32xf32>
    %188 = arith.addf %186, %187 : vector<16x32xf32>
    %189 = arith.addf %126, %188 : vector<16x32xf32>
    %cst_58 = arith.constant dense<0.000000e+00> : vector<16xf32>
    %190 = vector.multi_reduction <add>, %189, %cst_58 [1] : vector<16x32xf32> to vector<16xf32>
    %191 = vector.shape_cast %190 : vector<16xf32> to vector<16x1xf32>
    %cst_59 = arith.constant 3.200000e+01 : f32
    %192 = vector.broadcast %cst_59 : f32 to vector<16x1xf32>
    %193 = arith.divf %191, %192 : vector<16x1xf32>
    %194 = arith.mulf %189, %189 : vector<16x32xf32>
    %cst_60 = arith.constant dense<0.000000e+00> : vector<16xf32>
    %195 = vector.multi_reduction <add>, %194, %cst_60 [1] : vector<16x32xf32> to vector<16xf32>
    %196 = vector.shape_cast %195 : vector<16xf32> to vector<16x1xf32>
    %cst_61 = arith.constant 3.200000e+01 : f32
    %197 = vector.broadcast %cst_61 : f32 to vector<16x1xf32>
    %198 = arith.divf %196, %197 : vector<16x1xf32>
    %199 = arith.mulf %193, %193 : vector<16x1xf32>
    %200 = arith.subf %198, %199 : vector<16x1xf32>
    %201 = vector.broadcast %193 : vector<16x1xf32> to vector<16x32xf32>
    %202 = arith.subf %189, %201 : vector<16x32xf32>
    %cst_62 = arith.constant 9.99999974E-6 : f32
    %203 = vector.broadcast %cst_62 : f32 to vector<16x1xf32>
    %204 = arith.addf %200, %203 : vector<16x1xf32>
    %205 = math.rsqrt %204 : vector<16x1xf32>
    %206 = vector.broadcast %205 : vector<16x1xf32> to vector<16x32xf32>
    %207 = arith.mulf %202, %206 : vector<16x32xf32>
    %208 = vector.broadcast %139 : vector<1x32xf32> to vector<16x32xf32>
    %209 = arith.mulf %207, %208 : vector<16x32xf32>
    %210 = vector.broadcast %140 : vector<1x32xf32> to vector<16x32xf32>
    %211 = arith.addf %209, %210 : vector<16x32xf32>
    %cst_63 = arith.constant dense<0.000000e+00> : vector<16x64xf32>
    %212 = tpu.matmul %211, %132, %cst_63 {dimension_numbers = #tpu.dot_dimension_numbers<[1], [0], [0], [1], [0, 0, 1, 1], [], []>} : vector<16x32xf32>, vector<32x64xf32>, vector<16x64xf32> -> vector<16x64xf32>
    %213 = vector.broadcast %141 : vector<1x64xf32> to vector<16x64xf32>
    %214 = arith.addf %212, %213 : vector<16x64xf32>
    %cst_64 = arith.constant 0.000000e+00 : f32
    %215 = vector.broadcast %cst_64 : f32 to vector<16x64xf32>
    %216 = arith.maximumf %214, %215 : vector<16x64xf32>
    %cst_65 = arith.constant dense<0.000000e+00> : vector<16x32xf32>
    %217 = tpu.matmul %216, %134, %cst_65 {dimension_numbers = #tpu.dot_dimension_numbers<[1], [0], [0], [1], [0, 0, 1, 1], [], []>} : vector<16x64xf32>, vector<64x32xf32>, vector<16x32xf32> -> vector<16x32xf32>
    %218 = vector.broadcast %142 : vector<1x32xf32> to vector<16x32xf32>
    %219 = arith.addf %217, %218 : vector<16x32xf32>
    %220 = arith.addf %211, %219 : vector<16x32xf32>
    %cst_66 = arith.constant dense<0.000000e+00> : vector<16xf32>
    %221 = vector.multi_reduction <add>, %220, %cst_66 [1] : vector<16x32xf32> to vector<16xf32>
    %222 = vector.shape_cast %221 : vector<16xf32> to vector<16x1xf32>
    %cst_67 = arith.constant 3.200000e+01 : f32
    %223 = vector.broadcast %cst_67 : f32 to vector<16x1xf32>
    %224 = arith.divf %222, %223 : vector<16x1xf32>
    %225 = arith.mulf %220, %220 : vector<16x32xf32>
    %cst_68 = arith.constant dense<0.000000e+00> : vector<16xf32>
    %226 = vector.multi_reduction <add>, %225, %cst_68 [1] : vector<16x32xf32> to vector<16xf32>
    %227 = vector.shape_cast %226 : vector<16xf32> to vector<16x1xf32>
    %cst_69 = arith.constant 3.200000e+01 : f32
    %228 = vector.broadcast %cst_69 : f32 to vector<16x1xf32>
    %229 = arith.divf %227, %228 : vector<16x1xf32>
    %230 = arith.mulf %224, %224 : vector<16x1xf32>
    %231 = arith.subf %229, %230 : vector<16x1xf32>
    %232 = vector.broadcast %224 : vector<16x1xf32> to vector<16x32xf32>
    %233 = arith.subf %220, %232 : vector<16x32xf32>
    %cst_70 = arith.constant 9.99999974E-6 : f32
    %234 = vector.broadcast %cst_70 : f32 to vector<16x1xf32>
    %235 = arith.addf %231, %234 : vector<16x1xf32>
    %236 = math.rsqrt %235 : vector<16x1xf32>
    %237 = vector.broadcast %236 : vector<16x1xf32> to vector<16x32xf32>
    %238 = arith.mulf %233, %237 : vector<16x32xf32>
    %239 = vector.broadcast %143 : vector<1x32xf32> to vector<16x32xf32>
    %240 = arith.mulf %238, %239 : vector<16x32xf32>
    %241 = vector.broadcast %144 : vector<1x32xf32> to vector<16x32xf32>
    %242 = arith.addf %240, %241 : vector<16x32xf32>
    %c128 = arith.constant 128 : index
    %c0_71 = arith.constant 0 : index
    %243 = vector.load %arg1[%c128, %c0_71] : memref<248x128xf32, #tpu.memory_space<vmem>>, vector<32x128xf32>
    %cst_72 = arith.constant dense<0.000000e+00> : vector<16x128xf32>
    %244 = tpu.matmul %242, %243, %cst_72 {dimension_numbers = #tpu.dot_dimension_numbers<[1], [0], [0], [1], [0, 0, 1, 1], [], []>} : vector<16x32xf32>, vector<32x128xf32>, vector<16x128xf32> -> vector<16x128xf32>
    %c240 = arith.constant 240 : index
    %c0_73 = arith.constant 0 : index
    %245 = vector.load %arg1[%c240, %c0_73] : memref<248x128xf32, #tpu.memory_space<vmem>>, vector<1x128xf32>
    %246 = vector.broadcast %245 : vector<1x128xf32> to vector<16x128xf32>
    %247 = arith.addf %244, %246 : vector<16x128xf32>
    %c0_74 = arith.constant 0 : index
    %c0_75 = arith.constant 0 : index
    %248 = vector.load %arg3[%c0_74, %c0_75] : memref<16x128xf32, #tpu.memory_space<vmem>>, vector<16x128xf32>
    tpu.vector_store %arg3[%c0_74, %c0_75], %247 {strides = array<i32>} : memref<16x128xf32, #tpu.memory_space<vmem>>, vector<16x128xf32>,
    return
  }
}

</mosaic_0001>

<bundles_post_ra>
// kernel: decoder_forward.1
= control target key start
LH: loop header
LB: loop body
LE: loop exit
PB: predicated region body
PF: predicated region fallthrough
CT: control target
= control target key end

     0   :  { %8 = vsyncpa [#allocation3], 0  ;;  %s3480_s0 = inlined_call_operand.vmem [shape: s32[16,1], index: 0, kind: input, shape index: {}]   ;;  %s3481_s1 = inlined_call_operand.hbm [shape: f32[248,128], index: 1, kind: input, shape index: {}]   ;;  %s3482_s2 = inlined_call_operand.hbm [shape: f32[2,168,128], index: 2, kind: input, shape index: {}]   ;;  %s3483_s3 = inlined_call_operand.hbm [shape: f32[16,128], index: 3, kind: output, shape index: {}]  }
   0x1   :  { %9 = vsyncpa [#allocation6], 0 }
   0x2   :  { %10 = vsyncpa [#allocation4], 0  ;;  %s3011_s12 = smov [#allocation2]   ;;  %s2939_s16 = scalar_lea.hbm %s3481_s1, 3968 }
   0x3   :  { %s18_s13 = sshll.u32 %s3011_s12, 4  ;;  %p2940_p0 = scmp.ne.s32.totalorder %s3481_s1, %s2939_s16  ;;  %s19_s13 = int_to_ptr.vmem [resolvable:$true] %s18_s13 }
   0x4   :  { %p2943_p1 = scmp.lt.u32.totalorder %s2939_s16, %s3481_s1 }
   0x6   :  { %p2945_p2 = pnand %p2943_p1, %p2940_p0 }
   0x8   :  { %2948 = shalt.err (!%p2945_p2)
}
   0x9   :  { %s2949_s21 = scalar_lea.vmem %s19_s13, 3968  ;;  %p2954_p4 = scmp.lt.s32.totalorder %s19_s13, %s19_s13 }
   0xa   :  { %p2950_p3 = scmp.ne.s32.totalorder %s19_s13, %s2949_s21  ;;  %p2955_p5 = scmp.lt.s32.totalorder %s2949_s21, %s2949_s21 }
   0xc   :  { %p2956_p6 = por %p2955_p5, %p2954_p4 }
   0xe   :  { %p2957_p7 = pnand %p2956_p6, %p2950_p3 }
  0x10   :  { %2960 = shalt.err (!%p2957_p7)
}
  0x11   :  { %s3012_s22 = smov 128   ;;  %s3013_s23 = smov 8  }
  0x12   :  { %24 = dma.hbm_to_vmem [thread:$0]  %s3481_s1, 3968, %s19_s13, [#allocation3], %s3012_s22, %s3012_s22, %s3013_s23  }
  0x13   :  { %s3014_s26 = smov [#allocation5]   ;;  %s2961_s30 = scalar_lea.hbm %s3482_s2, 5376 }
  0x14   :  { %s30_s27 = sshll.u32 %s3014_s26, 4  ;;  %p2962_p8 = scmp.ne.s32.totalorder %s3482_s2, %s2961_s30  ;;  %s31_s27 = int_to_ptr.vmem [resolvable:$true] %s30_s27 }
  0x15   :  { %p2965_p9 = scmp.lt.u32.totalorder %s2961_s30, %s3482_s2 }
  0x17   :  { %p2967_p10 = pnand %p2965_p9, %p2962_p8 }
  0x19   :  { %2970 = shalt.err (!%p2967_p10)
}
  0x1a   :  { %s2971_s8 = scalar_lea.vmem %s31_s27, 5376  ;;  %p2976_p12 = scmp.lt.s32.totalorder %s31_s27, %s31_s27 }
  0x1b   :  { %p2972_p11 = scmp.ne.s32.totalorder %s31_s27, %s2971_s8  ;;  %p2977_p13 = scmp.lt.s32.totalorder %s2971_s8, %s2971_s8 }
  0x1d   :  { %p2978_p0 = por %p2977_p13, %p2976_p12 }
  0x1f   :  { %p2979_p1 = pnand %p2978_p0, %p2972_p11 }
  0x21   :  { %2982 = shalt.err (!%p2979_p1)
}
  0x22   :  { %36 = dma.hbm_to_vmem [thread:$0]  %s3482_s2, 5376, %s31_s27, [#allocation6], %s3012_s22, %s3012_s22, %s3013_s23  }
  0x23   :  { %3005 = dma.done.wait [#allocation3], 3968  }
  0x24   :  { %3006 = vsyncadd [#allocation3], 4294963328 }
  0x25   :  { %3007 = dma.done.wait [#allocation6], 5376  }
  0x26   :  { %3008 = vsyncadd [#allocation6], 4294961920  ;;  %v3015_v0 = vmov 0   ;;  %v43_v1 = vld [vmem:[%s3480_s0] sm:$0xff]  ;;  %v60_v3 = vld [vmem:[#allocation2 + $0x8] sm:$0xff]  ;;  %v45_v30 = vlaneseq  ;;  %v3016_v33 = vmov 1.0  }
  0x27   :  { %2778 = vset.pattern.permute.xlu0 %v3015_v0  ;;  %v59_v2 = vld [vmem:[#allocation2] sm:$0xff]  ;;  %v61_v4 = vld [vmem:[#allocation2 + $0x10] sm:$0xff]  ;;  %v62_v5 = vld [vmem:[#allocation2 + $0x18] sm:$0xff]  ;;  %vm185_vm2 = vcmask 261120   ;;  %vm297_vm3 = vcmask 64512   ;;  %s3018_s2 = smov 120  }
  0x28   :  { %48 = vperm.xlu0 %2778, %v43_v1   ;;  %v44_v6 = vld [vmem:[%s3480_s0 + $0x8] sm:$0xff]  ;;  %v2564_v7 = vpack.c.bf16 %v60_v3, %v59_v2  ;;  %v2568_v8 = vpack.c.bf16 %v62_v5, %v61_v4  ;;  %v63_v9 = vld [vmem:[#allocation2 + $0x20] sm:$0xff]  ;;  %v160_v12 = vld [vmem:[#allocation5] sm:$0xff]  ;;  %v46_v31 = vand.u32 127, %v45_v30  ;;  %v3089_v44 = vshrl.u32 %v45_v30, 7  ;;  %s3017_s0 = smov 112  }
  0x29   :  { %v64_v10 = vld [vmem:[#allocation2 + $0x28] sm:$0xff]  ;;  %v161_v13 = vld [vmem:[#allocation5 + $0x8] sm:$0xff]  ;;  %v65_v14 = vld [vmem:[#allocation2 + $0x30] sm:$0xff]  ;;  %s3019_s14 = smov 104   ;;  %s3020_s15 = smov 96   ;;  %vm451_vm5 = vcmask 523264  }
  0x2a   :  { %2565 = vmatprep.subr.bf16.mxu0 %v2564_v7  ;;  %v2572_v11 = vpack.c.bf16 %v64_v10, %v63_v9  ;;  %v66_v15 = vld [vmem:[#allocation2 + $0x38] sm:$0xff]  ;;  %v2596_v16 = vpack.c.bf16 %v161_v13, %v160_v12  ;;  %v67_v18 = vld [vmem:[#allocation2 + $0x40] sm:$0xff]  ;;  %v68_v19 = vld [vmem:[#allocation2 + $0x48] sm:$0xff]  ;;  %v183_v45 = vsub.s32 0, %v3089_v44  ;;  %s3021_s16 = smov 64   ;;  %s3022_s17 = smov 16  }
  0x2b   :  { %2567 = vmatpush3.bf16.msra.mxu0 %v2564_v7  ;;  %v2576_v17 = vpack.c.bf16 %v66_v15, %v65_v14  ;;  %v2580_v20 = vpack.c.bf16 %v68_v19, %v67_v18  ;;  %v69_v21 = vld [vmem:[#allocation2 + $0x50] sm:$0xff]  ;;  %v70_v22 = vld [vmem:[#allocation2 + $0x58] sm:$0xff]  ;;  %v71_v24 = vld [vmem:[#allocation2 + $0x60] sm:$0xff]  ;;  %s3023_s18 = smov 24   ;;  %vm719_vm6 = vcmask 130048   ;;  %vm722_vm7 = vcmask 195584  }
  0x2c   :  { %51 = vperm.xlu0 %2778, %v44_v6   ;;  %2569 = vmatprep.subr.bf16.mxu0 %v2568_v8  ;;  %v2584_v23 = vpack.c.bf16 %v70_v22, %v69_v21  ;;  %v72_v25 = vld [vmem:[#allocation2 + $0x68] sm:$0xff]  ;;  %v73_v27 = vld [vmem:[#allocation2 + $0x70] sm:$0xff]  ;;  %v74_v28 = vld [vmem:[#allocation2 + $0x78] sm:$0xff]  ;;  %s3024_s19 = smov [#allocation7]  }
  0x2d   :  { %2597 = vmatprep.subr.bf16.mxu1 %v2596_v16  ;;  %v2588_v26 = vpack.c.bf16 %v72_v25, %v71_v24  ;;  %v2592_v29 = vpack.c.bf16 %v74_v28, %v73_v27  ;;  %v162_v35 = vld [vmem:[#allocation5 + $0x10] sm:$0xff]  ;;  %v163_v36 = vld [vmem:[#allocation5 + $0x18] sm:$0xff]  ;;  %v75_v38 = vld [vmem:[#allocation2 + $0xa0] sm:$0xff]  ;;  %s2074_s20 = sshll.u32 %s3024_s19, 4  ;;  %s2075_s20 = int_to_ptr.vmem [resolvable:$true] %s2074_s20 }
  0x2e   :  { %2599 = vmatpush3.bf16.msra.mxu1 %v2596_v16  ;;  %v2600_v37 = vpack.c.bf16 %v163_v36, %v162_v35  ;;  %v76_v39 = vld [vmem:[#allocation2 + $0xa8] sm:$0xff]  ;;  %v3092_v46 = vld [vmem:[#allocation5 + $0xa0] sm:$0xff]  ;;  %vm3116_vm4 = vmpackc.low %vm297_vm3, %vm297_vm3  ;;  %s2983_s21 = scalar_lea.vmem %s2075_s20, 256  ;;  %p2988_p3 = scmp.lt.s32.totalorder %s2075_s20, %s2075_s20 }
  0x2f   :  { %2571 = vmatpush3.bf16.msra.mxu0 %v2568_v8  ;;  %v184_v47 = vrot.slane %v3092_v46, %v183_v45  ;;  %v3149_v16 = vld [vmem:[#allocation2 + $0xb8] sm:$0xff]  ;;  %v3151_v19 = vld [vmem:[#allocation2 + $0xb0] sm:$0xff]  ;;  %v3156_v27 = vld [vmem:[#allocation2 + $0xc0] sm:$0xff]  ;;  %p2984_p2 = scmp.ne.s32.totalorder %s2075_s20, %s2983_s21  ;;  %p2989_p4 = scmp.lt.s32.totalorder %s2983_s21, %s2983_s21 }
  0x30   :  { %2573 = vmatprep.subr.bf16.mxu0 %v2572_v11  ;;  %2601 = vmatprep.subr.bf16.mxu1 %v2600_v37  ;;  %v3159_v30 = vld [vmem:[#allocation2 + $0xc8] sm:$0xff]  ;;  %v3163_v35 = vld [vmem:[#allocation2 + $0xd0] sm:$0xff] }
  0x31   :  { %p2990_p5 = por %p2989_p4, %p2988_p3 }
  0x32   :  { %2603 = vmatpush3.bf16.msra.mxu1 %v2600_v37 }
  0x33   :  { %2575 = vmatpush3.bf16.msra.mxu0 %v2572_v11  ;;  %p2991_p6 = pnand %p2990_p5, %p2984_p2 }
  0x34   :  { %2577 = vmatprep.subr.bf16.mxu0 %v2576_v17 }
  0x37   :  { %2579 = vmatpush3.bf16.msra.mxu0 %v2576_v17 }
  0x38   :  { %2581 = vmatprep.subr.bf16.mxu0 %v2580_v20 }
  0x3b   :  { %2583 = vmatpush3.bf16.msra.mxu0 %v2580_v20 }
  0x3c   :  { %2585 = vmatprep.subr.bf16.mxu0 %v2584_v23 }
  0x3f   :  { %2587 = vmatpush3.bf16.msra.mxu0 %v2584_v23 }
  0x40   :  { %2589 = vmatprep.subr.bf16.mxu0 %v2588_v26 }
  0x43   :  { %2591 = vmatpush3.bf16.msra.mxu0 %v2588_v26 }
  0x44   :  { %2593 = vmatprep.subr.bf16.mxu0 %v2592_v29 }
  0x47   :  { %2595 = vmatpush3.bf16.msra.mxu0 %v2592_v29 }
  0xa7   :  { %v49_v32 = vpop.permute.xlu0 %48 }
  0xa8   :  { %vm53_vm0 = vcmp.eq.s32.totalorder %v46_v31, %v49_v32 }
  0xa9   :  { %2334 = vmatprep.mubr.msk.f32.mxu0 %vm53_vm0, %v3016_v33 }
  0xab   :  { %v52_v34 = vpop.permute.xlu0 %51 }
  0xac   :  { %vm54_vm1 = vcmp.eq.s32.totalorder %v46_v31, %v52_v34 }
  0xad   :  { %2335 = vmatmul.mubr.msk.f32.vlgmr.msra.gmra.mrb[0].mxu0 %vm54_vm1, %v3016_v33 }
 0x180   :  { %v2336_v40 = vpop.f32.mrb[0].mxu0 }
 0x181   :  { %v143_v41 = vpop.f32.mrb[1].mxu0  ;;  %v3083_v43 = vadd.f32 %v2336_v40, %v76_v39  ;;  %v3166_v39 = vld [vmem:[#allocation2 + $0xd8] sm:$0xff] }
 0x182   :  { %v3081_v42 = vadd.f32 %v143_v41, %v75_v38 }
 0x184   :  { %2345 = vmatprep.mubr.msk.f32.mxu1 %vm185_vm2, %v3081_v42 }
 0x185   :  { %2346 = vmatmul.mubr.msk.f32.vlgmr.msra.gmra.mrb[0].mxu1 %vm185_vm2, %v3083_v43 }
 0x258   :  { %v2347_v48 = vpop.f32.mrb[0].mxu1 }
 0x259   :  { %v258_v49 = vpop.f32.mrb[1].mxu1  ;;  %v264_v51 = vadd.f32 %v2347_v48, %v184_v47 }
 0x25a   :  { %v259_v50 = vadd.f32 %v258_v49, %v184_v47  ;;  %v3170_v49 = vld [vmem:[#allocation2 + $0xe0] sm:$0xff] }
 0x25c   :  { %273 = vrot.lane.b32.xlu0 %v259_v50, %s3017_s0  ;;  %269 = vrot.lane.b32.xlu1 %v259_v50, %s3018_s2  ;;  %v3102_v52 = vpack.i.bf16 %v264_v51, %v259_v50 }
 0x25d   :  { %2364 = vmatprep.mubr.msk.f32.mxu1 %vm297_vm3, %v259_v50 }
 0x260   :  { %277 = vrot.lane.b32.xlu0 %v259_v50, %s3019_s14  ;;  %271 = vrot.lane.b32.xlu1 %v264_v51, %s3018_s2 }
 0x264   :  { %2780 = vrot.lane.b32.xlu0 %v3102_v52, %s3020_s15  ;;  %275 = vrot.lane.b32.xlu1 %v264_v51, %s3017_s0 }
 0x268   :  { %279 = vrot.lane.b32.xlu1 %v264_v51, %s3019_s14 }
 0x2ce   :  { %v274_v53 = vpop.permute.xlu0 %273  ;;  %v270_v54 = vpop.permute.xlu1 %269 }
 0x2d2   :  { %v278_v55 = vpop.permute.xlu0 %277  ;;  %v272_v56 = vpop.permute.xlu1 %271 }
 0x2d3   :  { %v3108_v57 = vpack.i.bf16 %v272_v56, %v270_v54 }
 0x2d5   :  { %2785 = vrot.lane.b32.xlu1 %v3108_v57, %s3020_s15 }
 0x2d6   :  { %v2781_v58 = vpop.permute.xlu0 %2780  ;;  %v276_v59 = vpop.permute.xlu1 %275 }
 0x2d7   :  { %v2783_v60 = vunpack.i.h.bf16 %v2781_v58  ;;  %v2782_v61 = vunpack.i.l.bf16 %v2781_v58  ;;  %v3112_v62 = vpack.i.bf16 %v276_v59, %v274_v53 }
 0x2d9   :  { %v2604_v0 = vpack.c.bf16 %v2783_v60, %v2782_v61  ;;  %2790 = vrot.lane.b32.xlu0 %v3112_v62, %s3020_s15 }
 0x2da   :  { %v280_v1 = vpop.permute.xlu1 %279 }
 0x2db   :  { %v3122_v2 = vpack.i.bf16 %v280_v1, %v278_v55  ;;  %2606 = vmatprep.subr.msk.bf16.mxu1 %vm3116_vm4, %v2604_v0 }
 0x2dc   :  { %2609 = vmatpush3.bf16.xpose.msk.msra.mxu1 %vm3116_vm4, %v2604_v0 }
 0x2dd   :  { %2795 = vrot.lane.b32.xlu1 %v3122_v2, %s3020_s15 }
 0x347   :  { %v2786_v3 = vpop.permute.xlu1 %2785 }
 0x348   :  { %v2788_v4 = vunpack.i.h.bf16 %v2786_v3  ;;  %v2787_v5 = vunpack.i.l.bf16 %v2786_v3 }
 0x34a   :  { %v2610_v6 = vpack.c.bf16 %v2788_v4, %v2787_v5 }
 0x34b   :  { %v2791_v7 = vpop.permute.xlu0 %2790 }
 0x34c   :  { %v2793_v8 = vunpack.i.h.bf16 %v2791_v7  ;;  %v2792_v9 = vunpack.i.l.bf16 %v2791_v7  ;;  %2612 = vmatprep.subr.msk.bf16.mxu1 %vm3116_vm4, %v2610_v6 }
 0x34d   :  { %2615 = vmatpush3.bf16.xpose.msk.msra.mxu1 %vm3116_vm4, %v2610_v6 }
 0x34e   :  { %v2616_v10 = vpack.c.bf16 %v2793_v8, %v2792_v9 }
 0x34f   :  { %v2796_v11 = vpop.permute.xlu1 %2795 }
 0x350   :  { %v2798_v12 = vunpack.i.h.bf16 %v2796_v11  ;;  %v2797_v13 = vunpack.i.l.bf16 %v2796_v11  ;;  %2618 = vmatprep.subr.msk.bf16.mxu1 %vm3116_vm4, %v2616_v10 }
 0x352   :  { %v2622_v14 = vpack.c.bf16 %v2798_v12, %v2797_v13 }
 0x355   :  { %2621 = vmatpush3.bf16.xpose.msk.msra.mxu1 %vm3116_vm4, %v2616_v10 }
 0x356   :  { %2624 = vmatprep.subr.msk.bf16.mxu1 %vm3116_vm4, %v2622_v14 }
 0x35d   :  { %2627 = vmatpush3.bf16.xpose.msk.msra.mxu1 %vm3116_vm4, %v2622_v14 }
 0x364   :  { %2365 = vmatmul.mubr.msk.f32.vlgmr.msra.gmra.mrb[2].mxu1 %vm297_vm3, %v264_v51 }
 0x365   :  { %2367 = vmatprep.mubr.msk.f32.mxu1 %vm297_vm3, %v270_v54 }
 0x368   :  { %2368 = vmatmul.mubr.msk.f32.gmra.mrb[4].mxu1 %vm297_vm3, %v272_v56 }
 0x369   :  { %2370 = vmatprep.mubr.msk.f32.mxu1 %vm297_vm3, %v274_v53 }
 0x36c   :  { %2371 = vmatmul.mubr.msk.f32.gmra.mrb[6].mxu1 %vm297_vm3, %v276_v59 }
 0x36d   :  { %2373 = vmatprep.mubr.msk.f32.mxu1 %vm297_vm3, %v278_v55  ;;  %v3174_v55 = vld [vmem:[#allocation2 + $0xe8] sm:$0xff] }
 0x370   :  { %2374 = vmatmul.mubr.msk.f32.gmra.mrb[8].mxu1 %vm297_vm3, %v280_v1 }
 0x437   :  { %v2366_v15 = vpop.f32.mrb[2].mxu1 }
 0x438   :  { %v436_v17 = vmul.f32 0.35355338, %v2366_v15  ;;  %v396_v18 = vpop.f32.mrb[3].mxu1 }
 0x439   :  { %v435_v20 = vmul.f32 0.35355338, %v396_v18 }
 0x43a   :  { %v444_v21 = vadd.f32 %v436_v17, %v3149_v16 }
 0x43b   :  { %v2369_v22 = vpop.f32.mrb[4].mxu1  ;;  %v443_v23 = vadd.f32 %v435_v20, %v3151_v19 }
 0x43c   :  { %v438_v24 = vmul.f32 0.35355338, %v2369_v22  ;;  %v406_v25 = vpop.f32.mrb[5].mxu1  ;;  %v455_v26 = vsel %vm451_vm5, %v444_v21, -inf }
 0x43d   :  { %v437_v28 = vmul.f32 0.35355338, %v406_v25  ;;  %456 = vmax.xlane.f32.xlu1 %v455_v26  ;;  %v452_v29 = vsel %vm451_vm5, %v443_v23, -inf }
 0x43e   :  { %453 = vmax.xlane.f32.xlu0 %v452_v29  ;;  %v446_v34 = vadd.f32 %v438_v24, %v3159_v30 }
 0x43f   :  { %v2372_v31 = vpop.f32.mrb[6].mxu1  ;;  %v445_v32 = vadd.f32 %v437_v28, %v3156_v27 }
 0x440   :  { %v416_v33 = vpop.f32.mrb[7].mxu1  ;;  %v440_v36 = vmul.f32 0.35355338, %v2372_v31  ;;  %v461_v48 = vsel %vm451_vm5, %v446_v34, -inf }
 0x441   :  { %v439_v37 = vmul.f32 0.35355338, %v416_v33  ;;  %v458_v38 = vsel %vm451_vm5, %v445_v32, -inf }
 0x442   :  { %459 = vmax.xlane.f32.xlu0 %v458_v38  ;;  %v448_v54 = vadd.f32 %v440_v36, %v3166_v39 }
 0x443   :  { %v2375_v40 = vpop.f32.mrb[8].mxu1  ;;  %v447_v41 = vadd.f32 %v439_v37, %v3163_v35 }
 0x444   :  { %v426_v47 = vpop.f32.mrb[9].mxu1  ;;  %v442_v50 = vmul.f32 0.35355338, %v2375_v40  ;;  %v467_v58 = vsel %vm451_vm5, %v448_v54, -inf }
 0x445   :  { %v441_v51 = vmul.f32 0.35355338, %v426_v47  ;;  %v464_v53 = vsel %vm451_vm5, %v447_v41, -inf }
 0x446   :  { %462 = vmax.xlane.f32.xlu0 %v461_v48  ;;  %465 = vmax.xlane.f32.xlu1 %v464_v53  ;;  %v450_v60 = vadd.f32 %v442_v50, %v3174_v55 }
 0x447   :  { %v449_v56 = vadd.f32 %v441_v51, %v3170_v49 }
 0x448   :  { %v473_v61 = vsel %vm451_vm5, %v450_v60, -inf }
 0x449   :  { %v470_v59 = vsel %vm451_vm5, %v449_v56, -inf }
 0x44a   :  { %468 = vmax.xlane.f32.xlu0 %v467_v58  ;;  %471 = vmax.xlane.f32.xlu1 %v470_v59 }
 0x44e   :  { %474 = vmax.xlane.f32.xlu0 %v473_v61 }
 0x45b   :  { %2800 = vrot.lane.b32.xlu1 %v3102_v52, %s3021_s16 }
 0x4ca   :  { %v457_v0 = vpop.xlane.xlu1 %456 }
 0x4cb   :  { %v477_v1 = vsub.f32 %v444_v21, %v457_v0  ;;  %v454_v3 = vpop.xlane.xlu0 %453 }
 0x4cc   :  { %v476_v4 = vsub.f32 %v443_v23, %v454_v3 }
 0x4cd   :  { %v486_v5 = vmul.f32 1.442695, %v477_v1 }
 0x4ce   :  { %v484_v6 = vmul.f32 1.442695, %v476_v4 }
 0x4cf   :  { %2859 = vpow2.f32 %v486_v5  ;;  %v460_v7 = vpop.xlane.xlu0 %459 }
 0x4d0   :  { %2861 = vpow2.f32 %v484_v6  ;;  %v478_v8 = vsub.f32 %v445_v32, %v460_v7 }
 0x4d2   :  { %v488_v9 = vmul.f32 1.442695, %v478_v8 }
 0x4d3   :  { %v463_v10 = vpop.xlane.xlu0 %462  ;;  %v466_v11 = vpop.xlane.xlu1 %465 }
 0x4d4   :  { %2863 = vpow2.f32 %v488_v9  ;;  %v479_v12 = vsub.f32 %v446_v34, %v463_v10  ;;  %v480_v13 = vsub.f32 %v447_v41, %v466_v11 }
 0x4d6   :  { %v490_v14 = vmul.f32 1.442695, %v479_v12  ;;  %v492_v15 = vmul.f32 1.442695, %v480_v13 }
 0x4d7   :  { %v469_v17 = vpop.xlane.xlu0 %468  ;;  %v472_v52 = vpop.xlane.xlu1 %471 }
 0x4d8   :  { %2865 = vpow2.f32 %v490_v14  ;;  %v481_v18 = vsub.f32 %v448_v54, %v469_v17  ;;  %v482_v23 = vsub.f32 %v449_v56, %v472_v52 }
 0x4d9   :  { %v3183_v20 = vpop.eup %2859  ;;  %2867 = vpow2.f32 %v492_v15 }
 0x4da   :  { %v2862_v21 = vpop.eup %2861  ;;  %v494_v22 = vmul.f32 1.442695, %v481_v18  ;;  %v503_v24 = vsel %vm451_vm5, %v3183_v20, 0.0  ;;  %v496_v34 = vmul.f32 1.442695, %v482_v23 }
 0x4db   :  { %504 = vadd.xlane.f32.xlu0 %v503_v24  ;;  %v475_v25 = vpop.xlane.xlu0 %474  ;;  %v2801_v26 = vpop.permute.xlu1 %2800  ;;  %v500_v28 = vsel %vm451_vm5, %v2862_v21, 0.0 }
 0x4dc   :  { %2869 = vpow2.f32 %v494_v22  ;;  %v483_v29 = vsub.f32 %v450_v60, %v475_v25  ;;  %v2803_v31 = vunpack.i.h.bf16 %v2801_v26  ;;  %v2802_v32 = vunpack.i.l.bf16 %v2801_v26  ;;  %501 = vadd.xlane.f32.xlu1 %v500_v28 }
 0x4de   :  { %v3188_v33 = vpop.eup %2863  ;;  %v498_v36 = vmul.f32 1.442695, %v483_v29  ;;  %v2628_v37 = vpack.c.bf16 %v2803_v31, %v2802_v32 }
 0x4df   :  { %v506_v38 = vsel %vm451_vm5, %v3188_v33, 0.0 }
 0x4e0   :  { %2871 = vpow2.f32 %v498_v36  ;;  %507 = vadd.xlane.f32.xlu1 %v506_v38  ;;  %2629 = vmatprep.subr.bf16.mxu0 %v2628_v37  ;;  %v165_v36 = vld [vmem:[#allocation5 + $0x28] sm:$0xff]  ;;  %v166_v38 = vld [vmem:[#allocation5 + $0x30] sm:$0xff] }
 0x4e1   :  { %2631 = vmatpush3.bf16.msra.mxu0 %v2628_v37  ;;  %2873 = vpow2.f32 %v496_v34  ;;  %v164_v34 = vld [vmem:[#allocation5 + $0x20] sm:$0xff] }
 0x4e2   :  { %v3192_v40 = vpop.eup %2865  ;;  %v2644_v37 = vpack.c.bf16 %v165_v36, %v164_v34  ;;  %v176_v34 = vld [vmem:[#allocation5 + $0x80] sm:$0xff]  ;;  %v177_v36 = vld [vmem:[#allocation5 + $0x88] sm:$0xff] }
 0x4e3   :  { %v3194_v41 = vpop.eup %2867  ;;  %v509_v47 = vsel %vm451_vm5, %v3192_v40, 0.0 }
 0x4e4   :  { %510 = vadd.xlane.f32.xlu0 %v509_v47  ;;  %v512_v48 = vsel %vm451_vm5, %v3194_v41, 0.0  ;;  %2645 = vmatprep.subr.bf16.mxu1 %v2644_v37 }
 0x4e5   :  { %513 = vadd.xlane.f32.xlu1 %v512_v48  ;;  %2647 = vmatpush3.bf16.msra.mxu1 %v2644_v37  ;;  %v2668_v37 = vpack.c.bf16 %v177_v36, %v176_v34 }
 0x4e6   :  { %v3200_v50 = vpop.eup %2869 }
 0x4e7   :  { %v515_v51 = vsel %vm451_vm5, %v3200_v50, 0.0 }
 0x4e8   :  { %516 = vadd.xlane.f32.xlu0 %v515_v51 }
 0x4ea   :  { %v3204_v53 = vpop.eup %2871 }
 0x4eb   :  { %v521_v54 = vsel %vm451_vm5, %v3204_v53, 0.0  ;;  %v2874_v56 = vpop.eup %2873 }
 0x4ec   :  { %522 = vadd.xlane.f32.xlu0 %v521_v54  ;;  %v518_v58 = vsel %vm451_vm5, %v2874_v56, 0.0 }
 0x4f0   :  { %519 = vadd.xlane.f32.xlu0 %v518_v58 }
 0x4f6   :  { %2810 = vrot.lane.b32.xlu1 %v3112_v62, %s3021_s16 }
 0x4fa   :  { %2815 = vrot.lane.b32.xlu1 %v3122_v2, %s3021_s16 }
 0x506   :  { %2805 = vrot.lane.b32.xlu0 %v3108_v57, %s3021_s16 }
 0x568   :  { %v505_v60 = vpop.xlane.xlu0 %504 }
 0x569   :  { %v502_v59 = vpop.xlane.xlu1 %501 }
 0x56a   :  { %2875 = vrcp.f32 %v502_v59 }
 0x56b   :  { %2877 = vrcp.f32 %v505_v60 }
 0x56d   :  { %v508_v61 = vpop.xlane.xlu1 %507 }
 0x56e   :  { %2879 = vrcp.f32 %v508_v61 }
 0x571   :  { %v511_v0 = vpop.xlane.xlu0 %510 }
 0x572   :  { %v514_v5 = vpop.xlane.xlu1 %513  ;;  %2881 = vrcp.f32 %v511_v0 }
 0x573   :  { %2883 = vrcp.f32 %v514_v5 }
 0x574   :  { %v2876_v1 = vpop.eup %2875 }
 0x575   :  { %v517_v3 = vpop.xlane.xlu0 %516  ;;  %v532_v4 = vmul.f32 %v2876_v1, %v2862_v21  ;;  %v2878_v52 = vpop.eup %2877 }
 0x576   :  { %v2811_v7 = vpop.permute.xlu1 %2810  ;;  %2885 = vrcp.f32 %v517_v3  ;;  %v533_v21 = vmul.f32 %v2878_v52, %v3183_v20 }
 0x577   :  { %2392 = vmatprep.mubr.msk.f32.mxu0 %vm451_vm5, %v532_v4  ;;  %v2813_v9 = vunpack.i.h.bf16 %v2811_v7  ;;  %v2812_v2 = vunpack.i.l.bf16 %v2811_v7 }
 0x578   :  { %v2880_v18 = vpop.eup %2879 }
 0x579   :  { %v523_v6 = vpop.xlane.xlu0 %522  ;;  %v2636_v13 = vpack.c.bf16 %v2813_v9, %v2812_v2  ;;  %v534_v23 = vmul.f32 %v2880_v18, %v3188_v33  ;;  %v727_v9 = vsub.s32 1, %v3089_v44 }
 0x57a   :  { %v2816_v57 = vpop.permute.xlu1 %2815 }
 0x57b   :  { %v2818_v14 = vunpack.i.h.bf16 %v2816_v57  ;;  %v2817_v15 = vunpack.i.l.bf16 %v2816_v57  ;;  %v728_v2 = vrot.slane %v3092_v46, %v727_v9 }
 0x57c   :  { %v2882_v22 = vpop.eup %2881 }
 0x57d   :  { %v520_v62 = vpop.xlane.xlu0 %519  ;;  %v2640_v17 = vpack.c.bf16 %v2818_v14, %v2817_v15  ;;  %v2884_v24 = vpop.eup %2883  ;;  %v535_v25 = vmul.f32 %v2882_v22, %v3192_v40  ;;  %v167_v40 = vld [vmem:[#allocation5 + $0x38] sm:$0xff] }
 0x57e   :  { %2887 = vrcp.f32 %v520_v62  ;;  %v536_v28 = vmul.f32 %v2884_v24, %v3194_v41  ;;  %v2648_v41 = vpack.c.bf16 %v167_v40, %v166_v38  ;;  %v170_v24 = vld [vmem:[#allocation5 + $0x50] sm:$0xff] }
 0x57f   :  { %2889 = vrcp.f32 %v523_v6 }
 0x580   :  { %v2886_v26 = vpop.eup %2885  ;;  %2649 = vmatprep.subr.bf16.mxu1 %v2648_v41 }
 0x581   :  { %v2806_v8 = vpop.permute.xlu0 %2805  ;;  %v537_v20 = vmul.f32 %v2886_v26, %v3200_v50  ;;  %2651 = vmatpush3.bf16.msra.mxu1 %v2648_v41 }
 0x582   :  { %v2808_v10 = vunpack.i.h.bf16 %v2806_v8  ;;  %v2807_v11 = vunpack.i.l.bf16 %v2806_v8 }
 0x584   :  { %v2632_v12 = vpack.c.bf16 %v2808_v10, %v2807_v11 }
 0x586   :  { %2633 = vmatprep.subr.bf16.mxu0 %v2632_v12 }
 0x587   :  { %2635 = vmatpush3.bf16.msra.mxu0 %v2632_v12 }
 0x588   :  { %2637 = vmatprep.subr.bf16.mxu0 %v2636_v13  ;;  %v2888_v29 = vpop.eup %2887 }
 0x589   :  { %v2890_v31 = vpop.eup %2889  ;;  %v538_v32 = vmul.f32 %v2888_v29, %v2874_v56  ;;  %v173_v29 = vld [vmem:[#allocation5 + $0x68] sm:$0xff] }
 0x58a   :  { %v539_v33 = vmul.f32 %v2890_v31, %v3204_v53 }
 0x58b   :  { %2639 = vmatpush3.bf16.msra.mxu0 %v2636_v13 }
 0x58c   :  { %2641 = vmatprep.subr.bf16.mxu0 %v2640_v17 }
 0x58f   :  { %2643 = vmatpush3.bf16.msra.mxu0 %v2640_v17 }
 0x592   :  { %2393 = vmatmul.mubr.msk.f32.vlgmr.msra.gmra.mrb[2].mxu0 %vm451_vm5, %v533_v21 }
 0x593   :  { %2395 = vmatprep.mubr.msk.f32.mxu0 %vm451_vm5, %v534_v23  ;;  %v169_v23 = vld [vmem:[#allocation5 + $0x48] sm:$0xff] }
 0x596   :  { %2396 = vmatmul.mubr.msk.f32.gmra.mrb[4].mxu0 %vm451_vm5, %v535_v25  ;;  %v171_v25 = vld [vmem:[#allocation5 + $0x58] sm:$0xff] }
 0x597   :  { %2398 = vmatprep.mubr.msk.f32.mxu0 %vm451_vm5, %v536_v28  ;;  %v2656_v26 = vpack.c.bf16 %v171_v25, %v170_v24  ;;  %v172_v28 = vld [vmem:[#allocation5 + $0x60] sm:$0xff]  ;;  %v944_v24 = vsub.s32 5, %v3089_v44 }
 0x598   :  { %v2660_v31 = vpack.c.bf16 %v173_v29, %v172_v28 }
 0x599   :  { %v945_v25 = vrot.slane %v3092_v46, %v944_v24 }
 0x59a   :  { %2399 = vmatmul.mubr.msk.f32.gmra.mrb[6].mxu0 %vm451_vm5, %v537_v20  ;;  %v174_v20 = vld [vmem:[#allocation5 + $0x70] sm:$0xff]  ;;  %2661 = vmatprep.subr.bf16.mxu1 %v2660_v31 }
 0x59b   :  { %2401 = vmatprep.mubr.msk.f32.mxu0 %vm451_vm5, %v538_v32  ;;  %v175_v32 = vld [vmem:[#allocation5 + $0x78] sm:$0xff] }
 0x59e   :  { %2402 = vmatmul.mubr.msk.f32.gmra.mrb[8].mxu0 %vm451_vm5, %v539_v33  ;;  %v2664_v33 = vpack.c.bf16 %v175_v32, %v174_v20 }
 0x665   :  { %v2394_v47 = vpop.f32.mrb[2].mxu0 }
 0x666   :  { %v654_v48 = vpop.f32.mrb[3].mxu0 }
 0x669   :  { %v2397_v50 = vpop.f32.mrb[4].mxu0 }
 0x66a   :  { %697 = vrot.lane.b32.xlu1 %v2397_v50, %s3013_s23  ;;  %v664_v51 = vpop.f32.mrb[5].mxu0 }
 0x66d   :  { %v2400_v54 = vpop.f32.mrb[6].mxu0 }
 0x66e   :  { %695 = vrot.lane.b32.xlu1 %v664_v51, %s3013_s23  ;;  %v674_v53 = vpop.f32.mrb[7].mxu0 }
 0x66f   :  { %703 = vrot.lane.b32.xlu0 %v674_v53, %s3022_s17 }
 0x671   :  { %v2403_v56 = vpop.f32.mrb[8].mxu0 }
 0x672   :  { %705 = vrot.lane.b32.xlu1 %v2400_v54, %s3022_s17  ;;  %v684_v58 = vpop.f32.mrb[9].mxu0 }
 0x673   :  { %711 = vrot.lane.b32.xlu0 %v684_v58, %s3023_s18 }
 0x676   :  { %713 = vrot.lane.b32.xlu1 %v2403_v56, %s3023_s18 }
 0x6dc   :  { %v698_v59 = vpop.permute.xlu1 %697 }
 0x6dd   :  { %v718_v6 = vsel %vm297_vm3, %v2394_v47, %v698_v59 }
 0x6e0   :  { %v696_v60 = vpop.permute.xlu1 %695 }
 0x6e1   :  { %v704_v61 = vpop.permute.xlu0 %703  ;;  %v717_v0 = vsel %vm297_vm3, %v654_v48, %v696_v60 }
 0x6e2   :  { %v720_v3 = vsel %vm719_vm6, %v717_v0, %v704_v61  ;;  %v845_v0 = vsub.s32 2, %v3089_v44 }
 0x6e4   :  { %v706_v1 = vpop.permute.xlu1 %705 }
 0x6e5   :  { %v712_v4 = vpop.permute.xlu0 %711  ;;  %v721_v7 = vsel %vm719_vm6, %v718_v6, %v706_v1  ;;  %v851_v1 = vsub.s32 3, %v3089_v44 }
 0x6e6   :  { %v723_v5 = vsel %vm722_vm7, %v720_v3, %v712_v4  ;;  %v846_v4 = vrot.slane %v3092_v46, %v845_v0 }
 0x6e7   :  { %2412 = vmatprep.mubr.msk.f32.mxu1 %vm185_vm2, %v723_v5 }
 0x6e8   :  { %v714_v62 = vpop.permute.xlu1 %713 }
 0x6e9   :  { %v724_v8 = vsel %vm722_vm7, %v721_v7, %v714_v62  ;;  %v852_v7 = vrot.slane %v3092_v46, %v851_v1 }
 0x6ea   :  { %2413 = vmatmul.mubr.msk.f32.vlgmr.msra.gmra.mrb[10].mxu1 %vm185_vm2, %v724_v8 }
 0x6eb   :  { %2663 = vmatpush3.bf16.msra.mxu1 %v2660_v31 }
 0x6ec   :  { %2665 = vmatprep.subr.bf16.mxu1 %v2664_v33 }
 0x6ef   :  { %2667 = vmatpush3.bf16.msra.mxu1 %v2664_v33 }
 0x6f0   :  { %2669 = vmatprep.subr.bf16.mxu1 %v2668_v37 }
 0x6f3   :  { %2671 = vmatpush3.bf16.msra.mxu1 %v2668_v37 }
 0x7bd   :  { %v2414_v10 = vpop.f32.mrb[10].mxu1 }
 0x7be   :  { %v807_v11 = vadd.f32 %v2414_v10, %v728_v2  ;;  %v801_v57 = vpop.f32.mrb[11].mxu1 }
 0x7bf   :  { %v802_v12 = vadd.f32 %v801_v57, %v728_v2 }
 0x7c0   :  { %v3248_v13 = vadd.f32 %v807_v11, %v3083_v43  ;;  %v168_v43 = vld [vmem:[#allocation5 + $0x40] sm:$0xff] }
 0x7c1   :  { %v810_v14 = vadd.f32 %v802_v12, %v3081_v42  ;;  %v2652_v42 = vpack.c.bf16 %v169_v23, %v168_v43 }
 0x7c2   :  { %v815_v15 = vsel %vm185_vm2, %v3248_v13, 0.0  ;;  %v822_v21 = vmul.f32 %v3248_v13, %v3248_v13 }
 0x7c3   :  { %816 = vadd.xlane.f32.xlu1 %v815_v15  ;;  %v812_v17 = vsel %vm185_vm2, %v810_v14, 0.0  ;;  %v821_v52 = vmul.f32 %v810_v14, %v810_v14  ;;  %2653 = vmatprep.subr.bf16.mxu0 %v2652_v42  ;;  %v179_v15 = vld [vmem:[#allocation5 + $0x98] sm:$0xff] }
 0x7c4   :  { %813 = vadd.xlane.f32.xlu0 %v812_v17  ;;  %v826_v22 = vsel %vm185_vm2, %v822_v21, 0.0  ;;  %2655 = vmatpush3.bf16.msra.mxu0 %v2652_v42 }
 0x7c5   :  { %v823_v18 = vsel %vm185_vm2, %v821_v52, 0.0  ;;  %2657 = vmatprep.subr.bf16.mxu0 %v2656_v26  ;;  %v857_v52 = vsub.s32 4, %v3089_v44 }
 0x7c8   :  { %824 = vadd.xlane.f32.xlu0 %v823_v18  ;;  %2659 = vmatpush3.bf16.msra.mxu0 %v2656_v26 }
 0x7cc   :  { %827 = vadd.xlane.f32.xlu0 %v826_v22 }
 0x850   :  { %v817_v41 = vpop.xlane.xlu1 %816 }
 0x851   :  { %v814_v38 = vpop.xlane.xlu0 %813  ;;  %v820_v48 = vmul.f32 0.03125, %v817_v41  ;;  %v1072_v41 = vld [vmem:[#allocation5 + $0xa8] sm:$0xff] }
 0x852   :  { %v819_v40 = vmul.f32 0.03125, %v814_v38 }
 0x853   :  { %v832_v56 = vmul.f32 %v820_v48, %v820_v48  ;;  %v836_v62 = vsub.f32 %v3248_v13, %v820_v48  ;;  %v858_v13 = vrot.slane %v3092_v46, %v857_v52 }
 0x854   :  { %v831_v50 = vmul.f32 %v819_v40, %v819_v40  ;;  %v835_v3 = vsub.f32 %v810_v14, %v819_v40  ;;  %v178_v14 = vld [vmem:[#allocation5 + $0x90] sm:$0xff] }
 0x855   :  { %v825_v47 = vpop.xlane.xlu0 %824  ;;  %v2672_v17 = vpack.c.bf16 %v179_v15, %v178_v14 }
 0x856   :  { %v829_v51 = vmul.f32 0.03125, %v825_v47  ;;  %v1073_v47 = vld [vmem:[#allocation5 + $0xb0] sm:$0xff] }
 0x857   :  { %2673 = vmatprep.subr.bf16.mxu1 %v2672_v17  ;;  %v2676_v48 = vpack.c.bf16 %v1073_v47, %v1072_v41 }
 0x858   :  { %v833_v54 = vsub.f32 %v829_v51, %v831_v50  ;;  %2675 = vmatpush3.bf16.msra.mxu1 %v2672_v17  ;;  %v1074_v50 = vld [vmem:[#allocation5 + $0xb8] sm:$0xff]  ;;  %v1075_v51 = vld [vmem:[#allocation5 + $0xc0] sm:$0xff] }
 0x859   :  { %v828_v53 = vpop.xlane.xlu0 %827  ;;  %2677 = vmatprep.subr.bf16.mxu0 %v2676_v48 }
 0x85a   :  { %v837_v58 = vadd.f32 1e-05, %v833_v54  ;;  %v830_v59 = vmul.f32 0.03125, %v828_v53  ;;  %v2680_v54 = vpack.c.bf16 %v1075_v51, %v1074_v50 }
 0x85c   :  { %2891 = vrsqrt.f32 %v837_v58  ;;  %v834_v60 = vsub.f32 %v830_v59, %v832_v56 }
 0x85e   :  { %v838_v61 = vadd.f32 1e-05, %v834_v60 }
 0x860   :  { %2893 = vrsqrt.f32 %v838_v61 }
 0x866   :  { %v2892_v5 = vpop.eup %2891 }
 0x867   :  { %v841_v6 = vmul.f32 %v2892_v5, %v835_v3 }
 0x869   :  { %v847_v8 = vmul.f32 %v846_v4, %v841_v6 }
 0x86a   :  { %v2894_v2 = vpop.eup %2893 }
 0x86b   :  { %v842_v10 = vmul.f32 %v2894_v2, %v836_v62  ;;  %v853_v11 = vadd.f32 %v852_v7, %v847_v8 }
 0x86d   :  { %v848_v57 = vmul.f32 %v846_v4, %v842_v10  ;;  %2423 = vmatprep.mubr.msk.f32.mxu0 %vm185_vm2, %v853_v11  ;;  %v1061_v10 = vsub.s32 6, %v3089_v44 }
 0x86f   :  { %v854_v12 = vadd.f32 %v852_v7, %v848_v57 }
 0x871   :  { %2424 = vmatmul.mubr.msk.f32.vlgmr.msra.gmra.mrb[10].mxu0 %vm185_vm2, %v854_v12 }
 0x872   :  { %2679 = vmatpush3.bf16.msra.mxu0 %v2676_v48 }
 0x873   :  { %2681 = vmatprep.subr.bf16.mxu0 %v2680_v54 }
 0x876   :  { %2683 = vmatpush3.bf16.msra.mxu0 %v2680_v54 }
 0x944   :  { %v2425_v18 = vpop.f32.mrb[10].mxu0 }
 0x945   :  { %v937_v21 = vadd.f32 %v2425_v18, %v858_v13  ;;  %v931_v22 = vpop.f32.mrb[11].mxu0 }
 0x946   :  { %v932_v43 = vadd.f32 %v931_v22, %v858_v13 }
 0x947   :  { %v941_v42 = vmax.f32 %v937_v21, 0.0 }
 0x948   :  { %v940_v23 = vmax.f32 %v932_v43, 0.0 }
 0x94a   :  { %2442 = vmatprep.mubr.msk.f32.mxu1 %vm451_vm5, %v940_v23 }
 0x94b   :  { %2443 = vmatmul.mubr.msk.f32.vlgmr.msra.gmra.mrb[12].mxu1 %vm451_vm5, %v941_v42 }
 0xa1e   :  { %v2444_v26 = vpop.f32.mrb[12].mxu1 }
 0xa1f   :  { %v1024_v28 = vadd.f32 %v2444_v26, %v945_v25  ;;  %v1018_v29 = vpop.f32.mrb[13].mxu1 }
 0xa20   :  { %v1019_v20 = vadd.f32 %v1018_v29, %v945_v25  ;;  %v3299_v25 = vld [vmem:[#allocation5 + $0x148] sm:$0xff] }
 0xa21   :  { %v1028_v31 = vadd.f32 %v1024_v28, %v854_v12  ;;  %v1062_v12 = vrot.slane %v3092_v46, %v1061_v10  ;;  %v1096_v26 = vrot.slane %v3299_v25, %v183_v45 }
 0xa22   :  { %v1027_v32 = vadd.f32 %v1019_v20, %v853_v11  ;;  %v1067_v11 = vsub.s32 7, %v3089_v44 }
 0xa23   :  { %v1032_v33 = vsel %vm185_vm2, %v1028_v31, 0.0  ;;  %v1038_v34 = vmul.f32 %v1028_v31, %v1028_v31 }
 0xa24   :  { %1033 = vadd.xlane.f32.xlu0 %v1032_v33  ;;  %v1029_v36 = vsel %vm185_vm2, %v1027_v32, 0.0  ;;  %v1037_v37 = vmul.f32 %v1027_v32, %v1027_v32  ;;  %v1068_v21 = vrot.slane %v3092_v46, %v1067_v11 }
 0xa25   :  { %1030 = vadd.xlane.f32.xlu1 %v1029_v36  ;;  %v1042_v38 = vsel %vm185_vm2, %v1038_v34, 0.0 }
 0xa26   :  { %v1039_v40 = vsel %vm185_vm2, %v1037_v37, 0.0 }
 0xa28   :  { %1043 = vadd.xlane.f32.xlu0 %v1042_v38 }
 0xa29   :  { %1040 = vadd.xlane.f32.xlu1 %v1039_v40 }
 0xab1   :  { %v1034_v53 = vpop.xlane.xlu0 %1033 }
 0xab2   :  { %v1036_v56 = vmul.f32 0.03125, %v1034_v53  ;;  %v1031_v58 = vpop.xlane.xlu1 %1030 }
 0xab3   :  { %v1035_v59 = vmul.f32 0.03125, %v1031_v58 }
 0xab4   :  { %v1048_v61 = vmul.f32 %v1036_v56, %v1036_v56  ;;  %v1052_v57 = vsub.f32 %v1028_v31, %v1036_v56 }
 0xab5   :  { %v1044_v60 = vpop.xlane.xlu0 %1043  ;;  %v1047_v5 = vmul.f32 %v1035_v59, %v1035_v59  ;;  %v1051_v15 = vsub.f32 %v1027_v32, %v1035_v59 }
 0xab6   :  { %v1046_v3 = vmul.f32 0.03125, %v1044_v60  ;;  %v1041_v4 = vpop.xlane.xlu1 %1040 }
 0xab7   :  { %v1045_v6 = vmul.f32 0.03125, %v1041_v4 }
 0xab8   :  { %v1050_v7 = vsub.f32 %v1046_v3, %v1048_v61 }
 0xab9   :  { %v1049_v62 = vsub.f32 %v1045_v6, %v1047_v5 }
 0xaba   :  { %v1054_v8 = vadd.f32 1e-05, %v1050_v7 }
 0xabb   :  { %v1053_v2 = vadd.f32 1e-05, %v1049_v62 }
 0xabc   :  { %2895 = vrsqrt.f32 %v1054_v8 }
 0xabd   :  { %2897 = vrsqrt.f32 %v1053_v2 }
 0xac6   :  { %v2896_v14 = vpop.eup %2895 }
 0xac7   :  { %v2898_v17 = vpop.eup %2897  ;;  %v1058_v13 = vmul.f32 %v2896_v14, %v1052_v57 }
 0xac8   :  { %v1057_v18 = vmul.f32 %v2898_v17, %v1051_v15 }
 0xac9   :  { %v1064_v22 = vmul.f32 %v1062_v12, %v1058_v13 }
 0xaca   :  { %v1063_v43 = vmul.f32 %v1062_v12, %v1057_v18 }
 0xacb   :  { %v3293_v42 = vadd.f32 %v1068_v21, %v1064_v22 }
 0xacc   :  { %v3291_v23 = vadd.f32 %v1068_v21, %v1063_v43 }
 0xace   :  { %2453 = vmatprep.mubr.msk.f32.mxu0 %vm185_vm2, %v3291_v23 }
 0xacf   :  { %2454 = vmatmul.mubr.msk.f32.vlgmr.msra.gmra.mrb[12].mxu0 %vm185_vm2, %v3293_v42 }
 0xba2   :  { %v2455_v28 = vpop.f32.mrb[12].mxu0 }
 0xba3   :  { %v1175_v46 = vadd.f32 %v2455_v28, %v1096_v26  ;;  %v1169_v29 = vpop.f32.mrb[13].mxu0 }
 0xba4   :  { %v1170_v20 = vadd.f32 %v1169_v29, %v1096_v26 }
 0xba5   :  { %1182 = vrot.lane.b32.xlu0 %v1175_v46, %s3018_s2 }
 0xba6   :  { %1180 = vrot.lane.b32.xlu1 %v1170_v20, %s3018_s2  ;;  %2472 = vmatprep.mubr.msk.f32.mxu0 %vm297_vm3, %v1170_v20  ;;  %v3309_v31 = vpack.i.bf16 %v1175_v46, %v1170_v20 }
 0xba9   :  { %1188 = vrot.lane.b32.xlu0 %v1170_v20, %s3019_s14 }
 0xbaa   :  { %1184 = vrot.lane.b32.xlu1 %v1170_v20, %s3017_s0 }
 0xbad   :  { %2820 = vrot.lane.b32.xlu0 %v3309_v31, %s3020_s15 }
 0xbae   :  { %1186 = vrot.lane.b32.xlu1 %v1175_v46, %s3017_s0 }
 0xbb2   :  { %1190 = vrot.lane.b32.xlu1 %v1175_v46, %s3019_s14 }
 0xc17   :  { %v1183_v45 = vpop.permute.xlu0 %1182 }
 0xc18   :  { %v1181_v32 = vpop.permute.xlu1 %1180 }
 0xc19   :  { %v3315_v33 = vpack.i.bf16 %v1183_v45, %v1181_v32 }
 0xc1b   :  { %v1189_v34 = vpop.permute.xlu0 %1188  ;;  %2825 = vrot.lane.b32.xlu1 %v3315_v33, %s3020_s15 }
 0xc1c   :  { %v1185_v36 = vpop.permute.xlu1 %1184 }
 0xc1f   :  { %v2821_v37 = vpop.permute.xlu0 %2820 }
 0xc20   :  { %v2823_v38 = vunpack.i.h.bf16 %v2821_v37  ;;  %v2822_v40 = vunpack.i.l.bf16 %v2821_v37  ;;  %v1187_v41 = vpop.permute.xlu1 %1186 }
 0xc21   :  { %v3319_v47 = vpack.i.bf16 %v1187_v41, %v1185_v36 }
 0xc22   :  { %v2684_v48 = vpack.c.bf16 %v2823_v38, %v2822_v40 }
 0xc23   :  { %2830 = vrot.lane.b32.xlu0 %v3319_v47, %s3020_s15 }
 0xc24   :  { %2686 = vmatprep.subr.msk.bf16.mxu0 %vm3116_vm4, %v2684_v48  ;;  %v1191_v50 = vpop.permute.xlu1 %1190 }
 0xc25   :  { %v3325_v51 = vpack.i.bf16 %v1191_v50, %v1189_v34  ;;  %2689 = vmatpush3.bf16.xpose.msk.msra.mxu0 %vm3116_vm4, %v2684_v48 }
 0xc27   :  { %2835 = vrot.lane.b32.xlu1 %v3325_v51, %s3020_s15 }
 0xc8d   :  { %v2826_v54 = vpop.permute.xlu1 %2825 }
 0xc8e   :  { %v2828_v53 = vunpack.i.h.bf16 %v2826_v54  ;;  %v2827_v56 = vunpack.i.l.bf16 %v2826_v54 }
 0xc90   :  { %v2690_v58 = vpack.c.bf16 %v2828_v53, %v2827_v56 }
 0xc92   :  { %2692 = vmatprep.subr.msk.bf16.mxu0 %vm3116_vm4, %v2690_v58 }
 0xc93   :  { %2695 = vmatpush3.bf16.xpose.msk.msra.mxu0 %vm3116_vm4, %v2690_v58 }
 0xc95   :  { %v2831_v59 = vpop.permute.xlu0 %2830 }
 0xc96   :  { %v2833_v60 = vunpack.i.h.bf16 %v2831_v59  ;;  %v2832_v61 = vunpack.i.l.bf16 %v2831_v59 }
 0xc98   :  { %v2696_v3 = vpack.c.bf16 %v2833_v60, %v2832_v61 }
 0xc99   :  { %v2836_v4 = vpop.permute.xlu1 %2835 }
 0xc9a   :  { %v2838_v5 = vunpack.i.h.bf16 %v2836_v4  ;;  %v2837_v6 = vunpack.i.l.bf16 %v2836_v4  ;;  %2698 = vmatprep.subr.msk.bf16.mxu0 %vm3116_vm4, %v2696_v3 }
 0xc9b   :  { %2701 = vmatpush3.bf16.xpose.msk.msra.mxu0 %vm3116_vm4, %v2696_v3 }
 0xc9c   :  { %v2702_v7 = vpack.c.bf16 %v2838_v5, %v2837_v6 }
 0xc9e   :  { %2704 = vmatprep.subr.msk.bf16.mxu0 %vm3116_vm4, %v2702_v7 }
 0xca3   :  { %2707 = vmatpush3.bf16.xpose.msk.msra.mxu0 %vm3116_vm4, %v2702_v7 }
 0xcaa   :  { %2473 = vmatmul.mubr.msk.f32.vlgmr.msra.gmra.mrb[14].mxu0 %vm297_vm3, %v1175_v46 }
 0xcab   :  { %2475 = vmatprep.mubr.msk.f32.mxu0 %vm297_vm3, %v1181_v32 }
 0xcae   :  { %2476 = vmatmul.mubr.msk.f32.gmra.mrb[16].mxu0 %vm297_vm3, %v1183_v45 }
 0xcaf   :  { %2478 = vmatprep.mubr.msk.f32.mxu0 %vm297_vm3, %v1185_v36 }
 0xcb2   :  { %2479 = vmatmul.mubr.msk.f32.gmra.mrb[18].mxu0 %vm297_vm3, %v1187_v41 }
 0xcb3   :  { %2481 = vmatprep.mubr.msk.f32.mxu0 %vm297_vm3, %v1189_v34 }
 0xcb6   :  { %2482 = vmatmul.mubr.msk.f32.gmra.mrb[20].mxu0 %vm297_vm3, %v1191_v50 }
 0xd7d   :  { %v2474_v62 = vpop.f32.mrb[14].mxu0 }
 0xd7e   :  { %v1346_v8 = vmul.f32 0.35355338, %v2474_v62  ;;  %v1306_v2 = vpop.f32.mrb[15].mxu0 }
 0xd7f   :  { %v1345_v57 = vmul.f32 0.35355338, %v1306_v2 }
 0xd80   :  { %v1354_v63 = vadd.f32 %v1346_v8, %v3149_v16 }
 0xd81   :  { %v2477_v12 = vpop.f32.mrb[16].mxu0  ;;  %v1353_v14 = vadd.f32 %v1345_v57, %v3151_v19 }
 0xd82   :  { %v1348_v15 = vmul.f32 0.35355338, %v2477_v12  ;;  %v1316_v17 = vpop.f32.mrb[17].mxu0  ;;  %v1364_v13 = vsel %vm451_vm5, %v1354_v63, -inf }
 0xd83   :  { %v1347_v18 = vmul.f32 0.35355338, %v1316_v17  ;;  %1365 = vmax.xlane.f32.xlu1 %v1364_v13  ;;  %v1361_v21 = vsel %vm451_vm5, %v1353_v14, -inf }
 0xd84   :  { %1362 = vmax.xlane.f32.xlu0 %v1361_v21  ;;  %v1356_v28 = vadd.f32 %v1348_v15, %v3159_v30 }
 0xd85   :  { %v2480_v22 = vpop.f32.mrb[18].mxu0  ;;  %v1355_v43 = vadd.f32 %v1347_v18, %v3156_v27 }
 0xd86   :  { %v1326_v26 = vpop.f32.mrb[19].mxu0  ;;  %v1350_v46 = vmul.f32 0.35355338, %v2480_v22  ;;  %v1370_v32 = vsel %vm451_vm5, %v1356_v28, -inf }
 0xd87   :  { %v1349_v16 = vmul.f32 0.35355338, %v1326_v26  ;;  %v1367_v29 = vsel %vm451_vm5, %v1355_v43, -inf }
 0xd88   :  { %1368 = vmax.xlane.f32.xlu0 %v1367_v29  ;;  %v1358_v27 = vadd.f32 %v1350_v46, %v3166_v39 }
 0xd89   :  { %v2483_v19 = vpop.f32.mrb[20].mxu0  ;;  %v1357_v20 = vadd.f32 %v1349_v16, %v3163_v35 }
 0xd8a   :  { %v1336_v45 = vpop.f32.mrb[21].mxu0  ;;  %v1352_v34 = vmul.f32 0.35355338, %v2483_v19  ;;  %v1376_v38 = vsel %vm451_vm5, %v1358_v27, -inf }
 0xd8b   :  { %v1351_v36 = vmul.f32 0.35355338, %v1336_v45  ;;  %v1373_v37 = vsel %vm451_vm5, %v1357_v20, -inf }
 0xd8c   :  { %1371 = vmax.xlane.f32.xlu0 %v1370_v32  ;;  %1374 = vmax.xlane.f32.xlu1 %v1373_v37  ;;  %v1360_v41 = vadd.f32 %v1352_v34, %v3174_v55 }
 0xd8d   :  { %v1359_v30 = vadd.f32 %v1351_v36, %v3170_v49 }
 0xd8e   :  { %v1382_v35 = vsel %vm451_vm5, %v1360_v41, -inf }
 0xd8f   :  { %v1379_v40 = vsel %vm451_vm5, %v1359_v30, -inf }
 0xd90   :  { %1377 = vmax.xlane.f32.xlu0 %v1376_v38  ;;  %1380 = vmax.xlane.f32.xlu1 %v1379_v40 }
 0xd94   :  { %1383 = vmax.xlane.f32.xlu0 %v1382_v35 }
 0xda1   :  { %2840 = vrot.lane.b32.xlu1 %v3309_v31, %s3021_s16 }
 0xe10   :  { %v1366_v48 = vpop.xlane.xlu1 %1365 }
 0xe11   :  { %v1386_v39 = vsub.f32 %v1354_v63, %v1366_v48  ;;  %v1363_v50 = vpop.xlane.xlu0 %1362 }
 0xe12   :  { %v1385_v54 = vsub.f32 %v1353_v14, %v1363_v50 }
 0xe13   :  { %v1395_v53 = vmul.f32 1.442695, %v1386_v39 }
 0xe14   :  { %v1393_v49 = vmul.f32 1.442695, %v1385_v54 }
 0xe15   :  { %2899 = vpow2.f32 %v1395_v53  ;;  %v1369_v56 = vpop.xlane.xlu0 %1368 }
 0xe16   :  { %2901 = vpow2.f32 %v1393_v49  ;;  %v1387_v58 = vsub.f32 %v1355_v43, %v1369_v56 }
 0xe18   :  { %v1397_v59 = vmul.f32 1.442695, %v1387_v58 }
 0xe19   :  { %v1372_v55 = vpop.xlane.xlu0 %1371  ;;  %v1375_v60 = vpop.xlane.xlu1 %1374 }
 0xe1a   :  { %2903 = vpow2.f32 %v1397_v59  ;;  %v1388_v61 = vsub.f32 %v1356_v28, %v1372_v55  ;;  %v1389_v3 = vsub.f32 %v1357_v20, %v1375_v60 }
 0xe1c   :  { %v1399_v4 = vmul.f32 1.442695, %v1388_v61  ;;  %v1401_v5 = vmul.f32 1.442695, %v1389_v3 }
 0xe1d   :  { %v1378_v6 = vpop.xlane.xlu0 %1377  ;;  %v1381_v31 = vpop.xlane.xlu1 %1380 }
 0xe1e   :  { %2905 = vpow2.f32 %v1399_v4  ;;  %v1390_v7 = vsub.f32 %v1358_v27, %v1378_v6  ;;  %v1391_v57 = vsub.f32 %v1359_v30, %v1381_v31 }
 0xe1f   :  { %v3368_v62 = vpop.eup %2899  ;;  %2907 = vpow2.f32 %v1401_v5 }
 0xe20   :  { %v2902_v8 = vpop.eup %2901  ;;  %v1403_v2 = vmul.f32 1.442695, %v1390_v7  ;;  %v1412_v63 = vsel %vm451_vm5, %v3368_v62, 0.0  ;;  %v1405_v22 = vmul.f32 1.442695, %v1391_v57 }
 0xe21   :  { %1413 = vadd.xlane.f32.xlu0 %v1412_v63  ;;  %v1384_v12 = vpop.xlane.xlu0 %1383  ;;  %v2841_v14 = vpop.permute.xlu1 %2840  ;;  %v1409_v15 = vsel %vm451_vm5, %v2902_v8, 0.0 }
 0xe22   :  { %2909 = vpow2.f32 %v1403_v2  ;;  %v1392_v17 = vsub.f32 %v1360_v41, %v1384_v12  ;;  %v2843_v13 = vunpack.i.h.bf16 %v2841_v14  ;;  %v2842_v18 = vunpack.i.l.bf16 %v2841_v14  ;;  %1410 = vadd.xlane.f32.xlu1 %v1409_v15 }
 0xe24   :  { %v3373_v21 = vpop.eup %2903  ;;  %v1407_v43 = vmul.f32 1.442695, %v1392_v17  ;;  %v2708_v26 = vpack.c.bf16 %v2843_v13, %v2842_v18  ;;  %v1076_v13 = vld [vmem:[#allocation5 + $0xc8] sm:$0xff]  ;;  %v1077_v18 = vld [vmem:[#allocation5 + $0xd0] sm:$0xff] }
 0xe25   :  { %v1415_v28 = vsel %vm451_vm5, %v3373_v21, 0.0 }
 0xe26   :  { %2911 = vpow2.f32 %v1407_v43  ;;  %1416 = vadd.xlane.f32.xlu1 %v1415_v28  ;;  %2709 = vmatprep.subr.bf16.mxu1 %v2708_v26  ;;  %v1079_v43 = vld [vmem:[#allocation5 + $0xe0] sm:$0xff] }
 0xe27   :  { %2711 = vmatpush3.bf16.msra.mxu1 %v2708_v26  ;;  %2913 = vpow2.f32 %v1405_v22  ;;  %v1078_v22 = vld [vmem:[#allocation5 + $0xd8] sm:$0xff] }
 0xe28   :  { %v3377_v46 = vpop.eup %2905  ;;  %v2728_v26 = vpack.c.bf16 %v1079_v43, %v1078_v22 }
 0xe29   :  { %v3379_v16 = vpop.eup %2907  ;;  %v1418_v29 = vsel %vm451_vm5, %v3377_v46, 0.0 }
 0xe2a   :  { %1419 = vadd.xlane.f32.xlu0 %v1418_v29  ;;  %v1421_v19 = vsel %vm451_vm5, %v3379_v16, 0.0 }
 0xe2b   :  { %1422 = vadd.xlane.f32.xlu1 %v1421_v19 }
 0xe2c   :  { %v3385_v20 = vpop.eup %2909 }
 0xe2d   :  { %v1424_v45 = vsel %vm451_vm5, %v3385_v20, 0.0 }
 0xe2e   :  { %1425 = vadd.xlane.f32.xlu0 %v1424_v45 }
 0xe30   :  { %v3389_v32 = vpop.eup %2911 }
 0xe31   :  { %v1430_v34 = vsel %vm451_vm5, %v3389_v32, 0.0  ;;  %v2914_v36 = vpop.eup %2913 }
 0xe32   :  { %1431 = vadd.xlane.f32.xlu0 %v1430_v34  ;;  %v1427_v37 = vsel %vm451_vm5, %v2914_v36, 0.0 }
 0xe36   :  { %1428 = vadd.xlane.f32.xlu0 %v1427_v37 }
 0xe3c   :  { %2850 = vrot.lane.b32.xlu1 %v3319_v47, %s3021_s16 }
 0xe40   :  { %2855 = vrot.lane.b32.xlu1 %v3325_v51, %s3021_s16 }
 0xe4c   :  { %2845 = vrot.lane.b32.xlu0 %v3315_v33, %s3021_s16 }
 0xeae   :  { %v1414_v30 = vpop.xlane.xlu0 %1413 }
 0xeaf   :  { %v1411_v27 = vpop.xlane.xlu1 %1410 }
 0xeb0   :  { %2915 = vrcp.f32 %v1411_v27 }
 0xeb1   :  { %2917 = vrcp.f32 %v1414_v30 }
 0xeb3   :  { %v1417_v38 = vpop.xlane.xlu1 %1416 }
 0xeb4   :  { %2919 = vrcp.f32 %v1417_v38 }
 0xeb7   :  { %v1420_v40 = vpop.xlane.xlu0 %1419 }
 0xeb8   :  { %v1423_v39 = vpop.xlane.xlu1 %1422  ;;  %2921 = vrcp.f32 %v1420_v40 }
 0xeb9   :  { %2923 = vrcp.f32 %v1423_v39 }
 0xeba   :  { %v2916_v41 = vpop.eup %2915 }
 0xebb   :  { %v1426_v35 = vpop.xlane.xlu0 %1425  ;;  %v1441_v48 = vmul.f32 %v2916_v41, %v2902_v8  ;;  %v2918_v4 = vpop.eup %2917 }
 0xebc   :  { %v2851_v54 = vpop.permute.xlu1 %2850  ;;  %2925 = vrcp.f32 %v1426_v35  ;;  %v1442_v6 = vmul.f32 %v2918_v4, %v3368_v62  ;;  %v1081_v4 = vld [vmem:[#allocation5 + $0xf0] sm:$0xff] }
 0xebd   :  { %2500 = vmatprep.mubr.msk.f32.mxu1 %vm451_vm5, %v1441_v48  ;;  %v2853_v49 = vunpack.i.h.bf16 %v2851_v54  ;;  %v2852_v51 = vunpack.i.l.bf16 %v2851_v54  ;;  %v1635_v54 = vrot.slane %v3299_v25, %v727_v9 }
 0xebe   :  { %v2920_v5 = vpop.eup %2919 }
 0xebf   :  { %v1432_v50 = vpop.xlane.xlu0 %1431  ;;  %v2716_v55 = vpack.c.bf16 %v2853_v49, %v2852_v51  ;;  %v1443_v7 = vmul.f32 %v2920_v5, %v3373_v21  ;;  %v2724_v21 = vpack.c.bf16 %v1077_v18, %v1076_v13 }
 0xec0   :  { %v2856_v33 = vpop.permute.xlu1 %2855 }
 0xec1   :  { %v2858_v60 = vunpack.i.h.bf16 %v2856_v33  ;;  %v2857_v61 = vunpack.i.l.bf16 %v2856_v33 }
 0xec2   :  { %v2922_v31 = vpop.eup %2921 }
 0xec3   :  { %v1429_v47 = vpop.xlane.xlu0 %1428  ;;  %v2720_v3 = vpack.c.bf16 %v2858_v60, %v2857_v61  ;;  %v2924_v8 = vpop.eup %2923  ;;  %v1444_v2 = vmul.f32 %v2922_v31, %v3377_v46  ;;  %v1084_v31 = vld [vmem:[#allocation5 + $0x108] sm:$0xff] }
 0xec4   :  { %2927 = vrcp.f32 %v1429_v47  ;;  %v1445_v63 = vmul.f32 %v2924_v8, %v3379_v16  ;;  %v1086_v8 = vld [vmem:[#allocation5 + $0x118] sm:$0xff] }
 0xec5   :  { %2929 = vrcp.f32 %v1432_v50 }
 0xec6   :  { %v2926_v57 = vpop.eup %2925 }
 0xec7   :  { %v2846_v53 = vpop.permute.xlu0 %2845  ;;  %v1446_v62 = vmul.f32 %v2926_v57, %v3385_v20  ;;  %v1087_v57 = vld [vmem:[#allocation5 + $0x120] sm:$0xff] }
 0xec8   :  { %v2848_v56 = vunpack.i.h.bf16 %v2846_v53  ;;  %v2847_v58 = vunpack.i.l.bf16 %v2846_v53 }
 0xeca   :  { %v2712_v59 = vpack.c.bf16 %v2848_v56, %v2847_v58 }
 0xecc   :  { %2713 = vmatprep.subr.bf16.mxu1 %v2712_v59 }
 0xecd   :  { %2715 = vmatpush3.bf16.msra.mxu1 %v2712_v59 }
 0xece   :  { %2717 = vmatprep.subr.bf16.mxu1 %v2716_v55  ;;  %v2928_v12 = vpop.eup %2927 }
 0xecf   :  { %v2930_v14 = vpop.eup %2929  ;;  %v1447_v15 = vmul.f32 %v2928_v12, %v2914_v36  ;;  %v1088_v12 = vld [vmem:[#allocation5 + $0x128] sm:$0xff] }
 0xed0   :  { %v1448_v17 = vmul.f32 %v2930_v14, %v3389_v32 }
 0xed1   :  { %2719 = vmatpush3.bf16.msra.mxu1 %v2716_v55 }
 0xed2   :  { %2721 = vmatprep.subr.bf16.mxu1 %v2720_v3 }
 0xed5   :  { %2723 = vmatpush3.bf16.msra.mxu1 %v2720_v3  ;;  %v1080_v3 = vld [vmem:[#allocation5 + $0xe8] sm:$0xff] }
 0xed6   :  { %2725 = vmatprep.subr.bf16.mxu1 %v2724_v21  ;;  %v2732_v5 = vpack.c.bf16 %v1081_v4, %v1080_v3 }
 0xed8   :  { %2501 = vmatmul.mubr.msk.f32.vlgmr.msra.gmra.mrb[14].mxu1 %vm451_vm5, %v1442_v6 }
 0xed9   :  { %2503 = vmatprep.mubr.msk.f32.mxu1 %vm451_vm5, %v1443_v7  ;;  %2727 = vmatpush3.bf16.msra.mxu1 %v2724_v21  ;;  %v1085_v7 = vld [vmem:[#allocation5 + $0x110] sm:$0xff] }
 0xeda   :  { %2729 = vmatprep.subr.bf16.mxu1 %v2728_v26 }
 0xedc   :  { %2504 = vmatmul.mubr.msk.f32.gmra.mrb[16].mxu1 %vm451_vm5, %v1444_v2  ;;  %v2740_v2 = vpack.c.bf16 %v1085_v7, %v1084_v31  ;;  %v1979_v7 = vld [vmem:[#allocation2 + $0x90] sm:$0xff] }
 0xedd   :  { %2506 = vmatprep.mubr.msk.f32.mxu1 %vm451_vm5, %v1445_v63  ;;  %2731 = vmatpush3.bf16.msra.mxu1 %v2728_v26  ;;  %v2744_v63 = vpack.c.bf16 %v1087_v57, %v1086_v8  ;;  %v1980_v8 = vld [vmem:[#allocation2 + $0x98] sm:$0xff] }
 0xede   :  { %2733 = vmatprep.subr.bf16.mxu1 %v2732_v5  ;;  %2741 = vmatprep.subr.bf16.mxu0 %v2740_v2 }
 0xedf   :  { %2743 = vmatpush3.bf16.msra.mxu0 %v2740_v2  ;;  %v2760_v2 = vpack.c.bf16 %v1980_v8, %v1979_v7 }
 0xee0   :  { %2507 = vmatmul.mubr.msk.f32.gmra.mrb[18].mxu1 %vm451_vm5, %v1446_v62  ;;  %v1089_v62 = vld [vmem:[#allocation5 + $0x130] sm:$0xff]  ;;  %2745 = vmatprep.subr.bf16.mxu0 %v2744_v63 }
 0xee1   :  { %2509 = vmatprep.mubr.msk.f32.mxu1 %vm451_vm5, %v1447_v15  ;;  %v2748_v14 = vpack.c.bf16 %v1089_v62, %v1088_v12 }
 0xee3   :  { %2747 = vmatpush3.bf16.msra.mxu0 %v2744_v63 }
 0xee4   :  { %2510 = vmatmul.mubr.msk.f32.gmra.mrb[20].mxu1 %vm451_vm5, %v1448_v17  ;;  %2749 = vmatprep.subr.bf16.mxu0 %v2748_v14 }
 0xee7   :  { %2751 = vmatpush3.bf16.msra.mxu0 %v2748_v14 }
 0xfab   :  { %v2502_v28 = vpop.f32.mrb[14].mxu1 }
 0xfac   :  { %v1563_v46 = vpop.f32.mrb[15].mxu1 }
 0xfaf   :  { %v2505_v16 = vpop.f32.mrb[16].mxu1 }
 0xfb0   :  { %1606 = vrot.lane.b32.xlu1 %v2505_v16, %s3013_s23  ;;  %v1573_v29 = vpop.f32.mrb[17].mxu1 }
 0xfb3   :  { %v2508_v19 = vpop.f32.mrb[18].mxu1 }
 0xfb4   :  { %1604 = vrot.lane.b32.xlu1 %v1573_v29, %s3013_s23  ;;  %v1583_v20 = vpop.f32.mrb[19].mxu1 }
 0xfb5   :  { %1612 = vrot.lane.b32.xlu0 %v1583_v20, %s3022_s17 }
 0xfb7   :  { %v2511_v45 = vpop.f32.mrb[20].mxu1 }
 0xfb8   :  { %1614 = vrot.lane.b32.xlu1 %v2508_v19, %s3022_s17  ;;  %v1593_v32 = vpop.f32.mrb[21].mxu1 }
 0xfb9   :  { %1620 = vrot.lane.b32.xlu0 %v1593_v32, %s3023_s18  ;;  %v1752_v32 = vrot.slane %v3299_v25, %v845_v0 }
 0xfbc   :  { %1622 = vrot.lane.b32.xlu1 %v2511_v45, %s3023_s18 }
0x1022   :  { %v1607_v34 = vpop.permute.xlu1 %1606 }
0x1023   :  { %v1627_v35 = vsel %vm297_vm3, %v2502_v28, %v1607_v34 }
0x1026   :  { %v1605_v36 = vpop.permute.xlu1 %1604 }
0x1027   :  { %v1613_v37 = vpop.permute.xlu0 %1612  ;;  %v1626_v27 = vsel %vm297_vm3, %v1563_v46, %v1605_v36 }
0x1028   :  { %v1628_v38 = vsel %vm719_vm6, %v1626_v27, %v1613_v37  ;;  %v1758_v37 = vrot.slane %v3299_v25, %v851_v1  ;;  %v1764_v1 = vrot.slane %v3299_v25, %v857_v52 }
0x102a   :  { %v1615_v30 = vpop.permute.xlu1 %1614 }
0x102b   :  { %v1621_v40 = vpop.permute.xlu0 %1620  ;;  %v1629_v48 = vsel %vm719_vm6, %v1627_v35, %v1615_v30 }
0x102c   :  { %v1630_v41 = vsel %vm722_vm7, %v1628_v38, %v1621_v40 }
0x102d   :  { %2520 = vmatprep.mubr.msk.f32.mxu1 %vm185_vm2, %v1630_v41 }
0x102e   :  { %v1623_v39 = vpop.permute.xlu1 %1622 }
0x102f   :  { %v1631_v50 = vsel %vm722_vm7, %v1629_v48, %v1623_v39  ;;  %v1090_v39 = vld [vmem:[#allocation5 + $0x138] sm:$0xff] }
0x1030   :  { %2521 = vmatmul.mubr.msk.f32.vlgmr.msra.gmra.mrb[22].mxu1 %vm185_vm2, %v1631_v50  ;;  %v1091_v50 = vld [vmem:[#allocation5 + $0x140] sm:$0xff] }
0x1031   :  { %2735 = vmatpush3.bf16.msra.mxu1 %v2732_v5  ;;  %v2752_v0 = vpack.c.bf16 %v1091_v50, %v1090_v39 }
0x1033   :  { %2753 = vmatprep.subr.bf16.mxu0 %v2752_v0 }
0x1034   :  { %2755 = vmatpush3.bf16.msra.mxu0 %v2752_v0 }
0x1103   :  { %v2522_v47 = vpop.f32.mrb[22].mxu1 }
0x1104   :  { %v1714_v53 = vadd.f32 %v2522_v47, %v1635_v54  ;;  %v1708_v49 = vpop.f32.mrb[23].mxu1 }
0x1105   :  { %v1709_v51 = vadd.f32 %v1708_v49, %v1635_v54 }
0x1106   :  { %v1718_v56 = vadd.f32 %v1714_v53, %v3293_v42  ;;  %v1083_v42 = vld [vmem:[#allocation5 + $0x100] sm:$0xff] }
0x1107   :  { %v1717_v58 = vadd.f32 %v1709_v51, %v3291_v23  ;;  %v1082_v23 = vld [vmem:[#allocation5 + $0xf8] sm:$0xff] }
0x1108   :  { %v1722_v33 = vsel %vm185_vm2, %v1718_v56, 0.0  ;;  %v1728_v61 = vmul.f32 %v1718_v56, %v1718_v56  ;;  %v2736_v6 = vpack.c.bf16 %v1083_v42, %v1082_v23 }
0x1109   :  { %1723 = vadd.xlane.f32.xlu1 %v1722_v33  ;;  %v1719_v59 = vsel %vm185_vm2, %v1717_v58, 0.0  ;;  %v1727_v55 = vmul.f32 %v1717_v58, %v1717_v58 }
0x110a   :  { %1720 = vadd.xlane.f32.xlu0 %v1719_v59  ;;  %v1732_v9 = vsel %vm185_vm2, %v1728_v61, 0.0  ;;  %2737 = vmatprep.subr.bf16.mxu1 %v2736_v6 }
0x110b   :  { %v1729_v60 = vsel %vm185_vm2, %v1727_v55, 0.0  ;;  %2739 = vmatpush3.bf16.msra.mxu1 %v2736_v6  ;;  %v1978_v6 = vld [vmem:[#allocation2 + $0x88] sm:$0xff] }
0x110e   :  { %1730 = vadd.xlane.f32.xlu0 %v1729_v60 }
0x1112   :  { %1733 = vadd.xlane.f32.xlu0 %v1732_v9 }
0x1196   :  { %v1724_v13 = vpop.xlane.xlu1 %1723 }
0x1197   :  { %v1721_v15 = vpop.xlane.xlu0 %1720  ;;  %v1726_v21 = vmul.f32 0.03125, %v1724_v13 }
0x1198   :  { %v1725_v17 = vmul.f32 0.03125, %v1721_v15 }
0x1199   :  { %v1738_v46 = vmul.f32 %v1726_v21, %v1726_v21  ;;  %v1742_v27 = vsub.f32 %v1718_v56, %v1726_v21 }
0x119a   :  { %v1737_v22 = vmul.f32 %v1725_v17, %v1725_v17  ;;  %v1741_v45 = vsub.f32 %v1717_v58, %v1725_v17  ;;  %v1851_v58 = vrot.slane %v3299_v25, %v944_v24  ;;  %v1977_v24 = vld [vmem:[#allocation2 + $0x80] sm:$0xff] }
0x119b   :  { %v1731_v18 = vpop.xlane.xlu0 %1730  ;;  %v2756_v31 = vpack.c.bf16 %v1978_v6, %v1977_v24 }
0x119c   :  { %v1735_v43 = vmul.f32 0.03125, %v1731_v18 }
0x119d   :  { %2757 = vmatprep.subr.bf16.mxu1 %v2756_v31 }
0x119e   :  { %v1739_v26 = vsub.f32 %v1735_v43, %v1737_v22 }
0x119f   :  { %v1734_v28 = vpop.xlane.xlu0 %1733 }
0x11a0   :  { %v1743_v16 = vadd.f32 1e-05, %v1739_v26  ;;  %v1736_v29 = vmul.f32 0.03125, %v1734_v28 }
0x11a2   :  { %2931 = vrsqrt.f32 %v1743_v16  ;;  %v1740_v19 = vsub.f32 %v1736_v29, %v1738_v46  ;;  %v1968_v16 = vrot.slane %v3299_v25, %v1061_v10 }
0x11a4   :  { %v1744_v20 = vadd.f32 1e-05, %v1740_v19 }
0x11a6   :  { %2933 = vrsqrt.f32 %v1744_v20 }
0x11ac   :  { %v2932_v34 = vpop.eup %2931 }
0x11ad   :  { %v1747_v36 = vmul.f32 %v2932_v34, %v1741_v45  ;;  %v1974_v34 = vrot.slane %v3299_v25, %v1067_v11 }
0x11af   :  { %v1753_v30 = vmul.f32 %v1752_v32, %v1747_v36 }
0x11b0   :  { %v2934_v38 = vpop.eup %2933 }
0x11b1   :  { %v1748_v40 = vmul.f32 %v2934_v38, %v1742_v27  ;;  %v1759_v41 = vadd.f32 %v1758_v37, %v1753_v30  ;;  %v2155_v38 = vld [vmem:[#allocation2 + $0xf0] ss:$0 sm:$0xff] }
0x11b3   :  { %v1754_v35 = vmul.f32 %v1752_v32, %v1748_v40  ;;  %2531 = vmatprep.mubr.msk.f32.mxu1 %vm185_vm2, %v1759_v41 }
0x11b5   :  { %v1760_v48 = vadd.f32 %v1758_v37, %v1754_v35 }
0x11b7   :  { %2532 = vmatmul.mubr.msk.f32.vlgmr.msra.gmra.mrb[24].mxu1 %vm185_vm2, %v1760_v48 }
0x11b8   :  { %2759 = vmatpush3.bf16.msra.mxu1 %v2756_v31 }
0x11b9   :  { %2761 = vmatprep.subr.bf16.mxu1 %v2760_v2 }
0x11bc   :  { %2763 = vmatpush3.bf16.msra.mxu1 %v2760_v2 }
0x128a   :  { %v2533_v54 = vpop.f32.mrb[24].mxu1 }
0x128b   :  { %v1843_v47 = vadd.f32 %v2533_v54, %v1764_v1  ;;  %v1837_v53 = vpop.f32.mrb[25].mxu1 }
0x128c   :  { %v1838_v49 = vadd.f32 %v1837_v53, %v1764_v1 }
0x128d   :  { %v1847_v56 = vmax.f32 %v1843_v47, 0.0 }
0x128e   :  { %v1846_v51 = vmax.f32 %v1838_v49, 0.0 }
0x1290   :  { %2550 = vmatprep.mubr.msk.f32.mxu0 %vm451_vm5, %v1846_v51 }
0x1291   :  { %2551 = vmatmul.mubr.msk.f32.vlgmr.msra.gmra.mrb[22].mxu0 %vm451_vm5, %v1847_v56 }
0x1364   :  { %v2552_v33 = vpop.f32.mrb[22].mxu0 }
0x1365   :  { %v1930_v59 = vadd.f32 %v2552_v33, %v1851_v58  ;;  %v1924_v55 = vpop.f32.mrb[23].mxu0 }
0x1366   :  { %v1925_v60 = vadd.f32 %v1924_v55, %v1851_v58 }
0x1367   :  { %v1934_v61 = vadd.f32 %v1930_v59, %v1760_v48 }
0x1368   :  { %v1933_v52 = vadd.f32 %v1925_v60, %v1759_v41 }
0x1369   :  { %v1938_v9 = vsel %vm185_vm2, %v1934_v61, 0.0  ;;  %v1944_v3 = vmul.f32 %v1934_v61, %v1934_v61 }
0x136a   :  { %1939 = vadd.xlane.f32.xlu0 %v1938_v9  ;;  %v1935_v4 = vsel %vm185_vm2, %v1933_v52, 0.0  ;;  %v1943_v5 = vmul.f32 %v1933_v52, %v1933_v52 }
0x136b   :  { %1936 = vadd.xlane.f32.xlu1 %v1935_v4  ;;  %v1948_v23 = vsel %vm185_vm2, %v1944_v3, 0.0 }
0x136c   :  { %v1945_v42 = vsel %vm185_vm2, %v1943_v5, 0.0 }
0x136e   :  { %1949 = vadd.xlane.f32.xlu0 %v1948_v23 }
0x136f   :  { %1946 = vadd.xlane.f32.xlu1 %v1945_v42 }
0x13f7   :  { %v1940_v57 = vpop.xlane.xlu0 %1939 }
0x13f8   :  { %v1942_v63 = vmul.f32 0.03125, %v1940_v57  ;;  %v1937_v12 = vpop.xlane.xlu1 %1936 }
0x13f9   :  { %v1941_v62 = vmul.f32 0.03125, %v1937_v12 }
0x13fa   :  { %v1954_v15 = vmul.f32 %v1942_v63, %v1942_v63  ;;  %v1958_v46 = vsub.f32 %v1934_v61, %v1942_v63 }
0x13fb   :  { %v1950_v14 = vpop.xlane.xlu0 %1949  ;;  %v1953_v18 = vmul.f32 %v1941_v62, %v1941_v62  ;;  %v1957_v19 = vsub.f32 %v1933_v52, %v1941_v62 }
0x13fc   :  { %v1952_v17 = vmul.f32 0.03125, %v1950_v14  ;;  %v1947_v13 = vpop.xlane.xlu1 %1946 }
0x13fd   :  { %v1951_v21 = vmul.f32 0.03125, %v1947_v13 }
0x13fe   :  { %v1956_v22 = vsub.f32 %v1952_v17, %v1954_v15 }
0x13ff   :  { %v1955_v43 = vsub.f32 %v1951_v21, %v1953_v18 }
0x1400   :  { %v1960_v26 = vadd.f32 1e-05, %v1956_v22 }
0x1401   :  { %v1959_v28 = vadd.f32 1e-05, %v1955_v43 }
0x1402   :  { %2935 = vrsqrt.f32 %v1960_v26 }
0x1403   :  { %2937 = vrsqrt.f32 %v1959_v28 }
0x140c   :  { %v2936_v29 = vpop.eup %2935 }
0x140d   :  { %v2938_v20 = vpop.eup %2937  ;;  %v1964_v45 = vmul.f32 %v2936_v29, %v1958_v46 }
0x140e   :  { %v1963_v32 = vmul.f32 %v2938_v20, %v1957_v19 }
0x140f   :  { %v1970_v36 = vmul.f32 %v1968_v16, %v1964_v45 }
0x1410   :  { %v1969_v37 = vmul.f32 %v1968_v16, %v1963_v32 }
0x1411   :  { %v1976_v30 = vadd.f32 %v1974_v34, %v1970_v36 }
0x1412   :  { %v1975_v27 = vadd.f32 %v1974_v34, %v1969_v37 }
0x1414   :  { %2561 = vmatprep.mubr.msk.f32.mxu1 %vm185_vm2, %v1975_v27 }
0x1415   :  { %2562 = vmatmul.mubr.msk.f32.vlgmr.msra.gmra.mrb[26].mxu1 %vm185_vm2, %v1976_v30 }
0x14e8   :  { %v2563_v10 = vpop.f32.mrb[26].mxu1 }
0x14e9   :  { %v2064_v40 = vadd.f32 %v2563_v10, %v2155_v38  ;;  %v2058_v41 = vpop.f32.mrb[27].mxu1 }
0x14ea   :  { %v2059_v35 = vadd.f32 %v2155_v38, %v2058_v41 }
0x14eb   :  { %2068 = vst [vmem:[#allocation7 + $0x8] sm:$0xff] %v2064_v40 }
0x14ec   :  { %2067 = vst [vmem:[#allocation7] sm:$0xff] %v2059_v35 }
0x14ed   :  { %2994 = shalt.err (!%p2991_p6)
}
0x14ee   :  { %s2995_s26 = scalar_lea.hbm %s3483_s3, 256 }
0x14ef   :  { %p2996_p7 = scmp.ne.s32.totalorder %s3483_s3, %s2995_s26  ;;  %p2999_p8 = scmp.lt.u32.totalorder %s2995_s26, %s3483_s3 }
0x14f1   :  { %p3001_p9 = pnand %p2999_p8, %p2996_p7 }
0x14f3   :  { %3004 = shalt.err (!%p3001_p9)
}
0x14f4   :  { %2080 = dma.vmem_to_hbm [thread:$0]  %s2075_s20, 256, %s3483_s3, [#allocation4], %s3012_s22, %s3012_s22, %s3013_s23  }
0x14f5   :  { %3009 = dma.done.wait [#allocation4], 256  }
0x14f6   :  { %3010 = vsyncadd [#allocation4], 4294967040 }
0x14f7   :  { %2084 = vsyncpa [#allocation3], 1 }
0x14f8   :  { %2085 = vsyncpa [#allocation6], 1 }
0x14f9   :  { %2086 = vsyncpa [#allocation4], 1 }

</bundles_post_ra>
